<compile_context>
chip_gen: v6e
topology: v6e:2x2x1
jax: 0.10.0
libtpu: 0.0.40
codegen_flags: <defaults>
</compile_context>

<pallas_src>
import numpy as np
import jax
import jax.numpy as jnp
from jax.experimental import pallas as pl
from jax.experimental.pallas import tpu as pltpu

f32 = jnp.float32


def _make_kernel(nrp, lanes, inv_count, eps=1e-5):
    """Fused ConvGRUCell kernel for static padded row count `nrp`, lane width `lanes`."""
    NR, L = nrp, lanes

    def mm(a, w):
        # weights may be pre-cast to bf16 in the wrapper; f32 path is a no-op cast
        return jnp.dot(a.astype(w.dtype), w, preferred_element_type=f32)

    def kernel(up3_ref, x3_ref, acmb_ref, bxrz_ref, bxh_ref, bsrz_ref, bsh_ref,
               bn_ref, ggt_ref, mg2_ref, m1_ref, out_ref, ns_out_ref):
        mg2 = mg2_ref[...]                    # (2NR, 1) valid-row mask (parity-merged)
        ggt = ggt_ref[...]                    # (L, L) per-channel pooling matrix
        bn = bn_ref[...]                      # (6, L) tiled gamma/beta

        # ---- ConvTranspose2d(4,2,1): ONE K=3*w0*cu matmul; both output-row
        #      parities come out as lane blocks [even | odd] of SG1.
        sg1 = mm(up3_ref[...], acmb_ref[...]) * m1_ref[...]     # (NR+2, 2L)
        sge = sg1[:, 0:L]                                       # even state_hat (g1 space)
        sgo = sg1[:, L:2 * L]                                   # odd state_hat
        s_hat = jnp.concatenate([sge[1:NR + 1], sgo[1:NR + 1]], axis=0)  # (2NR, L)

        # ---- x-channel part of reset/update gates: ONE K=3*ww*cin matmul on
        #      the parity-merged, tap-stacked X3 buffer built by the wrapper.
        xpart_rz = mm(x3_ref[...], bxrz_ref[...])               # (2NR, 2L): [r | z]

        # ---- state_hat part of reset/update: parity-merged LHS per row tap,
        #      plain f32 adds of same-shape dots (MRB-friendly on v7x).
        lhs0 = jnp.concatenate([sgo[0:NR], sge[1:NR + 1]], axis=0)
        lhs2 = jnp.concatenate([sgo[1:NR + 1], sge[2:NR + 2]], axis=0)
        rz_pre = (xpart_rz + mm(lhs0, bsrz_ref[0]) + mm(s_hat, bsrz_ref[1])
                  + mm(lhs2, bsrz_ref[2]))                      # (2NR, 2L)

        def bn_stats(pre):
            m = pre * mg2
            s = jnp.sum(m, axis=0, keepdims=True)
            sq = jnp.sum(m * pre, axis=0, keepdims=True)        # mask is 0/1
            return s, sq

        def bn_apply(pre, mean, esq, gamma, beta, act):
            # One-pass batch statistics (see TODO at top about two-pass for prod).
            var = esq - mean * mean
            scale = jax.lax.rsqrt(var + eps) * gamma
            shift = beta - mean * scale
            return act(pre * scale + shift)

        # ---- fused BN statistics for r and z: single (4, L) pooling matmul.
        s_rz, sq_rz = bn_stats(rz_pre)
        stat4 = jnp.concatenate([s_rz[:, 0:L], s_rz[:, L:2 * L],
                                 sq_rz[:, 0:L], sq_rz[:, L:2 * L]], axis=0)
        pooled = jnp.dot(stat4, ggt, preferred_element_type=f32) * inv_count
        r = bn_apply(rz_pre[:, 0:L], pooled[0:1], pooled[2:3],
                     bn[0:1], bn[1:2], jax.nn.sigmoid)
        z = bn_apply(rz_pre[:, L:2 * L], pooled[1:2], pooled[3:4],
                     bn[2:3], bn[3:4], jax.nn.sigmoid)

        ns = r * s_hat                                          # new_state, (2NR, L)

        # ---- hidden gate: x-part deferred to here (keeps live vregs low);
        #      state-part operands built as row-shifted values (no VMEM scratch).
        ns_e = ns[0:NR]
        ns_o = ns[NR:2 * NR]
        zrow = jnp.zeros((1, L), f32)
        sd_o = jnp.concatenate([zrow, ns_o[0:NR - 1]], axis=0)   # shift down, zero halo
        su_e = jnp.concatenate([ns_e[1:NR], zrow], axis=0)       # shift up, zero halo
        lhs_h0 = jnp.concatenate([sd_o, ns_e], axis=0)
        lhs_h2 = jnp.concatenate([ns_o, su_e], axis=0)
        h_pre = (mm(x3_ref[...], bxh_ref[...]) + mm(lhs_h0, bsh_ref[0])
                 + mm(ns, bsh_ref[1]) + mm(lhs_h2, bsh_ref[2]))  # (2NR, L)

        # ---- fused BN statistics for h: single (2, L) pooling matmul.
        s_h, sq_h = bn_stats(h_pre)
        stat2 = jnp.concatenate([s_h, sq_h], axis=0)
        pooled_h = jnp.dot(stat2, ggt, preferred_element_type=f32) * inv_count
        h = bn_apply(h_pre, pooled_h[0:1], pooled_h[1:2], bn[4:5], bn[5:6], jnp.tanh)

        # ---- GRU combine; fully lane/sublane-dense stores.
        out_ref[...] = (1.0 - z) * s_hat + z * h
        ns_out_ref[...] = ns

    return kernel


def prepare_conv_gru(params, *, n, h0, w0, use_bf16_matmul=False):
    """One-time (per weight set / geometry) construction of banded weights,
    BN constants and row masks.  Hoisted out of the per-timestep call."""
    w_up = params["w_up_t"].astype(f32)          # (cu, cout, 4, 4)
    cu, cout = w_up.shape[0], w_up.shape[1]
    cin = params["w_r"].shape[1] - cout
    hh, ww = 2 * h0, 2 * w0
    L = ww * cout
    R = h0 + 2
    NR = n * R
    NRp = -(-NR // 8) * 8                        # pad rows to a multiple of 8
    wdt = jnp.bfloat16 if use_bf16_matmul else f32

    # 3x3 conv -> banded matrices (column/width structure baked in).
    p3 = [np.eye(ww, k=1, dtype=np.float32),
          np.eye(ww, dtype=np.float32),
          np.eye(ww, k=-1, dtype=np.float32)]

    def band3(w_gate, d, ch_lo, ch_hi):
        cp = ch_hi - ch_lo
        m = jnp.zeros((ww, cp, ww, cout), f32)
        for dx in range(3):
            m = m + jnp.einsum("IO,ci->IiOc", jnp.asarray(p3[dx]),
                               w_gate[:, ch_lo:ch_hi, d, dx].astype(f32))
        return m.reshape(ww * cp, ww * cout)

    w_r, w_z, w_h = params["w_r"], params["w_z"], params["w_h"]
    # x-part weights, K-stacked over the 3 row taps; r|z fused along N.
    bxrz = jnp.concatenate(
        [jnp.concatenate([band3(w_r, d, 0, cin), band3(w_z, d, 0, cin)], axis=1)
         for d in range(3)], axis=0)                              # (3*ww*cin, 2L)
    bxh = jnp.concatenate([band3(w_h, d, 0, cin) for d in range(3)], axis=0)  # (3*ww*cin, L)
    # state-part weights per row tap (parity-merged LHS in the kernel).
    bsrz = jnp.stack([jnp.concatenate([band3(w_r, d, cin, cin + cout),
                                       band3(w_z, d, cin, cin + cout)], axis=1)
                      for d in range(3)])                         # (3, L, 2L)
    bsh = jnp.stack([band3(w_h, d, cin, cin + cout) for d in range(3)])   # (3, L, L)

    # ConvTranspose2d(4,2,1) banded weights; the 3 input-row taps and both
    # output-row parities are combined into a single (3*w0*cu, 2L) matrix.
    q_kx = np.zeros((4, w0, ww), np.float32)
    for kx in range(4):
        for j in range(w0):
            X = 2 * j + kx - 1
            if 0 <= X < ww:
                q_kx[kx, j, X] = 1.0

    def band_up(ky):
        m = jnp.zeros((w0, cu, ww, cout), f32)
        for kx in range(4):
            m = m + jnp.einsum("jX,ic->jiXc", jnp.asarray(q_kx[kx]), w_up[:, :, ky, kx])
        return m.reshape(w0 * cu, ww * cout)

    zup = jnp.zeros((w0 * cu, L), f32)
    a_cmb = jnp.concatenate([
        jnp.concatenate([band_up(3), zup], axis=1),               # up[i]   tap
        jnp.concatenate([band_up(1), band_up(2)], axis=1),        # up[i+1] tap
        jnp.concatenate([zup, band_up(0)], axis=1)], axis=0)      # up[i+2] tap

    bn = jnp.stack([jnp.tile(params[k].astype(f32), ww)
                    for k in ("g_r", "b_r", "g_z", "b_z", "g_h", "b_h")])   # (6, L)
    ggt = jnp.tile(jnp.eye(cout, dtype=f32), (ww, ww))                       # (L, L)

    row_valid = np.zeros((NRp, 1), np.float32)
    for b in range(n):
        row_valid[b * R + 1: b * R + 1 + h0] = 1.0
    mg2 = jnp.asarray(np.concatenate([row_valid, row_valid], axis=0))        # (2NRp, 1)
    m1 = jnp.asarray(np.pad(row_valid, ((1, 1), (0, 0))))                    # (NRp+2, 1)

    return dict(a_cmb=a_cmb.astype(wdt), bxrz=bxrz.astype(wdt), bxh=bxh.astype(wdt),
                bsrz=bsrz.astype(wdt), bsh=bsh.astype(wdt),
                bn=bn, ggt=ggt, mg2=mg2, m1=m1)


def conv_gru_cell(x_nchw, old_state_nchw, attr, prep):
    """Pallas-backed ConvGRUCell.forward.  Inputs/outputs in PyTorch NCHW layout."""
    n, cin, hh, ww = x_nchw.shape
    h0, w0 = old_state_nchw.shape[2], old_state_nchw.shape[3]
    assert hh == 2 * h0 and ww == 2 * w0
    a = attr.shape[1]
    L = prep["bn"].shape[1]
    cout = L // ww
    R = h0 + 2
    NR = n * R
    NRp = prep["mg2"].shape[0] // 2
    pad_bot = NRp - NR
    inv_count = 1.0 / float(n * hh * ww)          # BatchNorm sample count per channel
    wdt = prep["bxrz"].dtype

    # NHWC, split rows by parity, fold width*channels into lanes, one zero pad
    # row per batch, global halo rows, and zero rows up to NRp.
    def fold_rows(v_nhwc, halo):
        nb, hb, wb, cb = v_nhwc.shape
        v = v_nhwc.reshape(nb, hb, wb * cb)
        v = jnp.pad(v, ((0, 0), (1, 1), (0, 0)))
        v = v.reshape(nb * (hb + 2), wb * cb)
        return jnp.pad(v, ((halo, halo + pad_bot), (0, 0)))

    x = jnp.transpose(x_nchw, (0, 2, 3, 1)).astype(f32)
    xe = fold_rows(x[:, 0::2], 1)                                   # (NRp+2, ww*cin)
    xo = fold_rows(x[:, 1::2], 1)
    # parity-merged (even block, then odd block), 3-tap lane-stacked x buffer.
    x3 = jnp.concatenate([
        jnp.concatenate([xo[0:NRp], xe[1:NRp + 1], xo[1:NRp + 1]], axis=1),
        jnp.concatenate([xe[1:NRp + 1], xo[1:NRp + 1], xe[2:NRp + 2]], axis=1)],
        axis=0).astype(wdt)                                          # (2NRp, 3*ww*cin)

    old = jnp.transpose(old_state_nchw, (0, 2, 3, 1)).astype(f32)
    attr_map = jnp.broadcast_to(attr.reshape(n, 1, 1, a), (n, h0, w0, a)).astype(f32)
    up = fold_rows(jnp.concatenate([old, attr_map], axis=-1), 2)     # (NRp+4, w0*cu)
    up3 = jnp.concatenate([up[0:NRp + 2], up[1:NRp + 3], up[2:NRp + 4]],
                          axis=1).astype(wdt)                        # (NRp+2, 3*w0*cu)

    kernel = _make_kernel(NRp, L, inv_count)
    vmem = pl.BlockSpec(memory_space=pltpu.MemorySpace.VMEM)
    out_pe, ns_pe = pl.pallas_call(
        kernel,
        out_shape=(jax.ShapeDtypeStruct((2 * NRp, L), f32),
                   jax.ShapeDtypeStruct((2 * NRp, L), f32)),
        in_specs=[vmem] * 11,
        out_specs=(vmem, vmem),
    )(up3, x3, prep["a_cmb"], prep["bxrz"], prep["bxh"], prep["bsrz"],
      prep["bsh"], prep["bn"], prep["ggt"], prep["mg2"], prep["m1"])

    def unfold(v):  # (2NRp, L) -> NCHW, interleaving row parities in the wrapper
        v = v.reshape(2, NRp, ww, cout)[:, :NR]
        v = v.reshape(2, n, R, ww, cout)[:, :, 1:h0 + 1]
        v = jnp.transpose(v, (1, 2, 0, 3, 4)).reshape(n, hh, ww, cout)
        return jnp.transpose(v, (0, 3, 1, 2))

    return unfold(out_pe), unfold(ns_pe)


def conv_gru_ref(x, old_state, attr, params):
    """Pure-JAX reference mirroring the PyTorch forward (NCHW)."""
    hp = jax.lax.Precision.HIGHEST
    n = old_state.shape[0]
    a = attr.shape[1]
    h0, w0 = old_state.shape[2], old_state.shape[3]
    attr_map = jnp.broadcast_to(attr.reshape(n, a, 1, 1), (n, a, h0, w0))
    up = jnp.concatenate([old_state, attr_map], axis=1)
    w_conv = jnp.flip(params["w_up_t"], axis=(2, 3)).transpose(1, 0, 2, 3)
    state_hat = jax.lax.conv_general_dilated(
        up, w_conv, window_strides=(1, 1), padding=((2, 2), (2, 2)),
        lhs_dilation=(2, 2), dimension_numbers=("NCHW", "OIHW", "NCHW"), precision=hp)

    def gate(inp, wt, gamma, beta, act):
        y = jax.lax.conv_general_dilated(
            inp, wt, window_strides=(1, 1), padding=((1, 1), (1, 1)),
            dimension_numbers=("NCHW", "OIHW", "NCHW"), precision=hp)
        mean = jnp.mean(y, axis=(0, 2, 3), keepdims=True)
        var = jnp.mean((y - mean) ** 2, axis=(0, 2, 3), keepdims=True)
        yn = (y - mean) * jax.lax.rsqrt(var + 1e-5)
        yn = yn * gamma.reshape(1, -1, 1, 1) + beta.reshape(1, -1, 1, 1)
        return act(yn)

    cat = jnp.concatenate([x, state_hat], axis=1)
    r = gate(cat, params["w_r"], params["g_r"], params["b_r"], jax.nn.sigmoid)
    z = gate(cat, params["w_z"], params["g_z"], params["b_z"], jax.nn.sigmoid)
    new_state = r * state_hat
    hid = gate(jnp.concatenate([x, new_state], axis=1),
               params["w_h"], params["g_h"], params["b_h"], jnp.tanh)
    out = (1.0 - z) * state_hat + z * hid
    return out, new_state


if __name__ == "__main__":
    n_attrs, in_dim, out_dim = 4, 4, 8
    n, h0, w0 = 2, 8, 8
    hh, ww = 2 * h0, 2 * w0

    keys = jax.random.split(jax.random.PRNGKey(0), 13)
    x = jax.random.normal(keys[0], (n, in_dim, hh, ww), jnp.float32)
    old_state = jax.random.normal(keys[1], (n, 2 * in_dim, h0, w0), jnp.float32)
    attr = jax.random.normal(keys[2], (n, n_attrs), jnp.float32)

    params = {
        # ConvTranspose2d weight: (in_dim*2 + n_attrs, out_dim, 4, 4)
        "w_up_t": 0.1 * jax.random.normal(keys[3], (2 * in_dim + n_attrs, out_dim, 4, 4), jnp.float32),
        # Conv2d weights: (out_dim, in_dim + out_dim, 3, 3)
        "w_r": 0.1 * jax.random.normal(keys[4], (out_dim, in_dim + out_dim, 3, 3), jnp.float32),
        "w_z": 0.1 * jax.random.normal(keys[5], (out_dim, in_dim + out_dim, 3, 3), jnp.float32),
        "w_h": 0.1 * jax.random.normal(keys[6], (out_dim, in_dim + out_dim, 3, 3), jnp.float32),
        # BatchNorm affine params
        "g_r": 1.0 + 0.1 * jax.random.normal(keys[7], (out_dim,), jnp.float32),
        "b_r": 0.1 * jax.random.normal(keys[8], (out_dim,), jnp.float32),
        "g_z": 1.0 + 0.1 * jax.random.normal(keys[9], (out_dim,), jnp.float32),
        "b_z": 0.1 * jax.random.normal(keys[10], (out_dim,), jnp.float32),
        "g_h": 1.0 + 0.1 * jax.random.normal(keys[11], (out_dim,), jnp.float32),
        "b_h": 0.1 * jax.random.normal(keys[12], (out_dim,), jnp.float32),
    }

    # One-time weight banding / constant construction (hoisted out of the step).
    prep = prepare_conv_gru(params, n=n, h0=h0, w0=w0, use_bf16_matmul=False)

    step = jax.jit(conv_gru_cell)
    out, new_state = step(x, old_state, attr, prep)
    jax.block_until_ready((out, new_state))

    ref_out, ref_ns = conv_gru_ref(x, old_state, attr, params)
    np.testing.assert_allclose(np.asarray(out), np.asarray(ref_out), rtol=1e-3, atol=1e-3)
    np.testing.assert_allclose(np.asarray(new_state), np.asarray(ref_ns), rtol=1e-3, atol=1e-3)

    print("KERNEL_OK")
</pallas_src>

<mosaic_0001>
module attributes {stable_mosaic.version = 11 : i64} {
  func.func @kernel(%arg0: memref<26x288xf32, #tpu.memory_space<vmem>>, %arg1: memref<48x192xf32, #tpu.memory_space<vmem>>, %arg2: memref<288x256xf32, #tpu.memory_space<vmem>>, %arg3: memref<192x256xf32, #tpu.memory_space<vmem>>, %arg4: memref<192x128xf32, #tpu.memory_space<vmem>>, %arg5: memref<3x128x256xf32, #tpu.memory_space<vmem>>, %arg6: memref<3x128x128xf32, #tpu.memory_space<vmem>>, %arg7: memref<6x128xf32, #tpu.memory_space<vmem>>, %arg8: memref<128x128xf32, #tpu.memory_space<vmem>>, %arg9: memref<48x1xf32, #tpu.memory_space<vmem>>, %arg10: memref<26x1xf32, #tpu.memory_space<vmem>>, %arg11: memref<48x128xf32, #tpu.memory_space<vmem>>, %arg12: memref<48x128xf32, #tpu.memory_space<vmem>>) attributes {dimension_semantics = [], scalar_prefetch = 0 : i64, scratch_operands = 0 : i64, tpu.core_type = #tpu.core_type<tc>} {
    %c0 = arith.constant 0 : index
    %c0_0 = arith.constant 0 : index
    %0 = vector.load %arg9[%c0, %c0_0] : memref<48x1xf32, #tpu.memory_space<vmem>>, vector<48x1xf32>
    %c0_1 = arith.constant 0 : index
    %c0_2 = arith.constant 0 : index
    %1 = vector.load %arg8[%c0_1, %c0_2] : memref<128x128xf32, #tpu.memory_space<vmem>>, vector<128x128xf32>
    %c0_3 = arith.constant 0 : index
    %c0_4 = arith.constant 0 : index
    %2 = vector.load %arg7[%c0_3, %c0_4] : memref<6x128xf32, #tpu.memory_space<vmem>>, vector<6x128xf32>
    %c0_5 = arith.constant 0 : index
    %c0_6 = arith.constant 0 : index
    %3 = vector.load %arg0[%c0_5, %c0_6] : memref<26x288xf32, #tpu.memory_space<vmem>>, vector<26x288xf32>
    %c0_7 = arith.constant 0 : index
    %c0_8 = arith.constant 0 : index
    %4 = vector.load %arg2[%c0_7, %c0_8] : memref<288x256xf32, #tpu.memory_space<vmem>>, vector<288x256xf32>
    %cst = arith.constant dense<0.000000e+00> : vector<26x256xf32>
    %5 = tpu.matmul %3, %4, %cst {dimension_numbers = #tpu.dot_dimension_numbers<[1], [0], [0], [1], [0, 0, 1, 1], [], []>} : vector<26x288xf32>, vector<288x256xf32>, vector<26x256xf32> -> vector<26x256xf32>
    %c0_9 = arith.constant 0 : index
    %c0_10 = arith.constant 0 : index
    %6 = vector.load %arg10[%c0_9, %c0_10] : memref<26x1xf32, #tpu.memory_space<vmem>>, vector<26x1xf32>
    %7 = vector.broadcast %6 : vector<26x1xf32> to vector<26x256xf32>
    %8 = arith.mulf %5, %7 : vector<26x256xf32>
    %9 = vector.extract_strided_slice %8 {offsets = [0, 0], sizes = [26, 128], strides = [1, 1]} : vector<26x256xf32> to vector<26x128xf32>
    %10 = vector.extract_strided_slice %8 {offsets = [0, 128], sizes = [26, 128], strides = [1, 1]} : vector<26x256xf32> to vector<26x128xf32>
    %11 = vector.extract_strided_slice %9 {offsets = [1, 0], sizes = [24, 128], strides = [1, 1]} : vector<26x128xf32> to vector<24x128xf32>
    %12 = vector.extract_strided_slice %10 {offsets = [1, 0], sizes = [24, 128], strides = [1, 1]} : vector<26x128xf32> to vector<24x128xf32>
    %13 = tpu.concatenate %11, %12 in 0 : vector<24x128xf32>, vector<24x128xf32> -> vector<48x128xf32>
    %c0_11 = arith.constant 0 : index
    %c0_12 = arith.constant 0 : index
    %14 = vector.load %arg1[%c0_11, %c0_12] : memref<48x192xf32, #tpu.memory_space<vmem>>, vector<48x192xf32>
    %c0_13 = arith.constant 0 : index
    %c0_14 = arith.constant 0 : index
    %15 = vector.load %arg3[%c0_13, %c0_14] : memref<192x256xf32, #tpu.memory_space<vmem>>, vector<192x256xf32>
    %cst_15 = arith.constant dense<0.000000e+00> : vector<48x256xf32>
    %16 = tpu.matmul %14, %15, %cst_15 {dimension_numbers = #tpu.dot_dimension_numbers<[1], [0], [0], [1], [0, 0, 1, 1], [], []>} : vector<48x192xf32>, vector<192x256xf32>, vector<48x256xf32> -> vector<48x256xf32>
    %17 = vector.extract_strided_slice %10 {offsets = [0, 0], sizes = [24, 128], strides = [1, 1]} : vector<26x128xf32> to vector<24x128xf32>
    %18 = vector.extract_strided_slice %9 {offsets = [1, 0], sizes = [24, 128], strides = [1, 1]} : vector<26x128xf32> to vector<24x128xf32>
    %19 = tpu.concatenate %17, %18 in 0 : vector<24x128xf32>, vector<24x128xf32> -> vector<48x128xf32>
    %20 = vector.extract_strided_slice %10 {offsets = [1, 0], sizes = [24, 128], strides = [1, 1]} : vector<26x128xf32> to vector<24x128xf32>
    %21 = vector.extract_strided_slice %9 {offsets = [2, 0], sizes = [24, 128], strides = [1, 1]} : vector<26x128xf32> to vector<24x128xf32>
    %22 = tpu.concatenate %20, %21 in 0 : vector<24x128xf32>, vector<24x128xf32> -> vector<48x128xf32>
    %c0_16 = arith.constant 0 : index
    %c0_17 = arith.constant 0 : index
    %c0_18 = arith.constant 0 : index
    %23 = vector.load %arg5[%c0_16, %c0_17, %c0_18] : memref<3x128x256xf32, #tpu.memory_space<vmem>>, vector<1x128x256xf32>
    %24 = vector.shape_cast %23 : vector<1x128x256xf32> to vector<128x256xf32>
    %cst_19 = arith.constant dense<0.000000e+00> : vector<48x256xf32>
    %25 = tpu.matmul %19, %24, %cst_19 {dimension_numbers = #tpu.dot_dimension_numbers<[1], [0], [0], [1], [0, 0, 1, 1], [], []>} : vector<48x128xf32>, vector<128x256xf32>, vector<48x256xf32> -> vector<48x256xf32>
    %26 = arith.addf %16, %25 : vector<48x256xf32>
    %c1 = arith.constant 1 : index
    %c0_20 = arith.constant 0 : index
    %c0_21 = arith.constant 0 : index
    %27 = vector.load %arg5[%c1, %c0_20, %c0_21] : memref<3x128x256xf32, #tpu.memory_space<vmem>>, vector<1x128x256xf32>
    %28 = vector.shape_cast %27 : vector<1x128x256xf32> to vector<128x256xf32>
    %cst_22 = arith.constant dense<0.000000e+00> : vector<48x256xf32>
    %29 = tpu.matmul %13, %28, %cst_22 {dimension_numbers = #tpu.dot_dimension_numbers<[1], [0], [0], [1], [0, 0, 1, 1], [], []>} : vector<48x128xf32>, vector<128x256xf32>, vector<48x256xf32> -> vector<48x256xf32>
    %30 = arith.addf %26, %29 : vector<48x256xf32>
    %c2 = arith.constant 2 : index
    %c0_23 = arith.constant 0 : index
    %c0_24 = arith.constant 0 : index
    %31 = vector.load %arg5[%c2, %c0_23, %c0_24] : memref<3x128x256xf32, #tpu.memory_space<vmem>>, vector<1x128x256xf32>
    %32 = vector.shape_cast %31 : vector<1x128x256xf32> to vector<128x256xf32>
    %cst_25 = arith.constant dense<0.000000e+00> : vector<48x256xf32>
    %33 = tpu.matmul %22, %32, %cst_25 {dimension_numbers = #tpu.dot_dimension_numbers<[1], [0], [0], [1], [0, 0, 1, 1], [], []>} : vector<48x128xf32>, vector<128x256xf32>, vector<48x256xf32> -> vector<48x256xf32>
    %34 = arith.addf %30, %33 : vector<48x256xf32>
    %35 = vector.broadcast %0 : vector<48x1xf32> to vector<48x256xf32>
    %36 = arith.mulf %34, %35 : vector<48x256xf32>
    %cst_26 = arith.constant dense<0.000000e+00> : vector<256xf32>
    %37 = vector.multi_reduction <add>, %36, %cst_26 [0] : vector<48x256xf32> to vector<256xf32>
    %38 = vector.shape_cast %37 : vector<256xf32> to vector<1x256xf32>
    %39 = arith.mulf %36, %34 : vector<48x256xf32>
    %cst_27 = arith.constant dense<0.000000e+00> : vector<256xf32>
    %40 = vector.multi_reduction <add>, %39, %cst_27 [0] : vector<48x256xf32> to vector<256xf32>
    %41 = vector.shape_cast %40 : vector<256xf32> to vector<1x256xf32>
    %42 = vector.extract_strided_slice %38 {offsets = [0, 0], sizes = [1, 128], strides = [1, 1]} : vector<1x256xf32> to vector<1x128xf32>
    %43 = vector.extract_strided_slice %38 {offsets = [0, 128], sizes = [1, 128], strides = [1, 1]} : vector<1x256xf32> to vector<1x128xf32>
    %44 = vector.extract_strided_slice %41 {offsets = [0, 0], sizes = [1, 128], strides = [1, 1]} : vector<1x256xf32> to vector<1x128xf32>
    %45 = vector.extract_strided_slice %41 {offsets = [0, 128], sizes = [1, 128], strides = [1, 1]} : vector<1x256xf32> to vector<1x128xf32>
    %46 = tpu.concatenate %42, %43, %44, %45 in 0 : vector<1x128xf32>, vector<1x128xf32>, vector<1x128xf32>, vector<1x128xf32> -> vector<4x128xf32>
    %cst_28 = arith.constant dense<0.000000e+00> : vector<4x128xf32>
    %47 = tpu.matmul %46, %1, %cst_28 {dimension_numbers = #tpu.dot_dimension_numbers<[1], [0], [0], [1], [0, 0, 1, 1], [], []>} : vector<4x128xf32>, vector<128x128xf32>, vector<4x128xf32> -> vector<4x128xf32>
    %cst_29 = arith.constant 0.001953125 : f32
    %48 = vector.broadcast %cst_29 : f32 to vector<4x128xf32>
    %49 = arith.mulf %47, %48 : vector<4x128xf32>
    %50 = vector.extract_strided_slice %34 {offsets = [0, 0], sizes = [48, 128], strides = [1, 1]} : vector<48x256xf32> to vector<48x128xf32>
    %51 = vector.extract_strided_slice %49 {offsets = [0, 0], sizes = [1, 128], strides = [1, 1]} : vector<4x128xf32> to vector<1x128xf32>
    %52 = vector.extract_strided_slice %49 {offsets = [2, 0], sizes = [1, 128], strides = [1, 1]} : vector<4x128xf32> to vector<1x128xf32>
    %53 = vector.extract_strided_slice %2 {offsets = [0, 0], sizes = [1, 128], strides = [1, 1]} : vector<6x128xf32> to vector<1x128xf32>
    %54 = vector.extract_strided_slice %2 {offsets = [1, 0], sizes = [1, 128], strides = [1, 1]} : vector<6x128xf32> to vector<1x128xf32>
    %55 = arith.mulf %51, %51 : vector<1x128xf32>
    %56 = arith.subf %52, %55 : vector<1x128xf32>
    %cst_30 = arith.constant 9.99999974E-6 : f32
    %57 = vector.broadcast %cst_30 : f32 to vector<1x128xf32>
    %58 = arith.addf %56, %57 : vector<1x128xf32>
    %59 = math.rsqrt %58 : vector<1x128xf32>
    %60 = arith.mulf %59, %53 : vector<1x128xf32>
    %61 = arith.mulf %51, %60 : vector<1x128xf32>
    %62 = arith.subf %54, %61 : vector<1x128xf32>
    %63 = vector.broadcast %60 : vector<1x128xf32> to vector<48x128xf32>
    %64 = arith.mulf %50, %63 : vector<48x128xf32>
    %65 = vector.broadcast %62 : vector<1x128xf32> to vector<48x128xf32>
    %66 = arith.addf %64, %65 : vector<48x128xf32>
    %67 = arith.negf %66 : vector<48x128xf32>
    %68 = math.exp %67 : vector<48x128xf32>
    %cst_31 = arith.constant 1.000000e+00 : f32
    %69 = vector.broadcast %cst_31 : f32 to vector<48x128xf32>
    %70 = arith.addf %69, %68 : vector<48x128xf32>
    %71 = arith.divf %69, %70 : vector<48x128xf32>
    %72 = vector.extract_strided_slice %34 {offsets = [0, 128], sizes = [48, 128], strides = [1, 1]} : vector<48x256xf32> to vector<48x128xf32>
    %73 = vector.extract_strided_slice %49 {offsets = [1, 0], sizes = [1, 128], strides = [1, 1]} : vector<4x128xf32> to vector<1x128xf32>
    %74 = vector.extract_strided_slice %49 {offsets = [3, 0], sizes = [1, 128], strides = [1, 1]} : vector<4x128xf32> to vector<1x128xf32>
    %75 = vector.extract_strided_slice %2 {offsets = [2, 0], sizes = [1, 128], strides = [1, 1]} : vector<6x128xf32> to vector<1x128xf32>
    %76 = vector.extract_strided_slice %2 {offsets = [3, 0], sizes = [1, 128], strides = [1, 1]} : vector<6x128xf32> to vector<1x128xf32>
    %77 = arith.mulf %73, %73 : vector<1x128xf32>
    %78 = arith.subf %74, %77 : vector<1x128xf32>
    %cst_32 = arith.constant 9.99999974E-6 : f32
    %79 = vector.broadcast %cst_32 : f32 to vector<1x128xf32>
    %80 = arith.addf %78, %79 : vector<1x128xf32>
    %81 = math.rsqrt %80 : vector<1x128xf32>
    %82 = arith.mulf %81, %75 : vector<1x128xf32>
    %83 = arith.mulf %73, %82 : vector<1x128xf32>
    %84 = arith.subf %76, %83 : vector<1x128xf32>
    %85 = vector.broadcast %82 : vector<1x128xf32> to vector<48x128xf32>
    %86 = arith.mulf %72, %85 : vector<48x128xf32>
    %87 = vector.broadcast %84 : vector<1x128xf32> to vector<48x128xf32>
    %88 = arith.addf %86, %87 : vector<48x128xf32>
    %89 = arith.negf %88 : vector<48x128xf32>
    %90 = math.exp %89 : vector<48x128xf32>
    %cst_33 = arith.constant 1.000000e+00 : f32
    %91 = vector.broadcast %cst_33 : f32 to vector<48x128xf32>
    %92 = arith.addf %91, %90 : vector<48x128xf32>
    %93 = arith.divf %91, %92 : vector<48x128xf32>
    %94 = arith.mulf %71, %13 : vector<48x128xf32>
    %95 = vector.extract_strided_slice %94 {offsets = [0, 0], sizes = [24, 128], strides = [1, 1]} : vector<48x128xf32> to vector<24x128xf32>
    %96 = vector.extract_strided_slice %94 {offsets = [24, 0], sizes = [24, 128], strides = [1, 1]} : vector<48x128xf32> to vector<24x128xf32>
    %cst_34 = arith.constant 0.000000e+00 : f32
    %97 = vector.broadcast %cst_34 : f32 to vector<1x128xf32>
    %98 = vector.extract_strided_slice %96 {offsets = [0, 0], sizes = [23, 128], strides = [1, 1]} : vector<24x128xf32> to vector<23x128xf32>
    %99 = tpu.concatenate %97, %98 in 0 : vector<1x128xf32>, vector<23x128xf32> -> vector<24x128xf32>
    %100 = vector.extract_strided_slice %95 {offsets = [1, 0], sizes = [23, 128], strides = [1, 1]} : vector<24x128xf32> to vector<23x128xf32>
    %101 = tpu.concatenate %100, %97 in 0 : vector<23x128xf32>, vector<1x128xf32> -> vector<24x128xf32>
    %102 = tpu.concatenate %99, %95 in 0 : vector<24x128xf32>, vector<24x128xf32> -> vector<48x128xf32>
    %103 = tpu.concatenate %96, %101 in 0 : vector<24x128xf32>, vector<24x128xf32> -> vector<48x128xf32>
    %c0_35 = arith.constant 0 : index
    %c0_36 = arith.constant 0 : index
    %104 = vector.load %arg1[%c0_35, %c0_36] : memref<48x192xf32, #tpu.memory_space<vmem>>, vector<48x192xf32>
    %c0_37 = arith.constant 0 : index
    %c0_38 = arith.constant 0 : index
    %105 = vector.load %arg4[%c0_37, %c0_38] : memref<192x128xf32, #tpu.memory_space<vmem>>, vector<192x128xf32>
    %cst_39 = arith.constant dense<0.000000e+00> : vector<48x128xf32>
    %106 = tpu.matmul %104, %105, %cst_39 {dimension_numbers = #tpu.dot_dimension_numbers<[1], [0], [0], [1], [0, 0, 1, 1], [], []>} : vector<48x192xf32>, vector<192x128xf32>, vector<48x128xf32> -> vector<48x128xf32>
    %c0_40 = arith.constant 0 : index
    %c0_41 = arith.constant 0 : index
    %c0_42 = arith.constant 0 : index
    %107 = vector.load %arg6[%c0_40, %c0_41, %c0_42] : memref<3x128x128xf32, #tpu.memory_space<vmem>>, vector<1x128x128xf32>
    %108 = vector.shape_cast %107 : vector<1x128x128xf32> to vector<128x128xf32>
    %cst_43 = arith.constant dense<0.000000e+00> : vector<48x128xf32>
    %109 = tpu.matmul %102, %108, %cst_43 {dimension_numbers = #tpu.dot_dimension_numbers<[1], [0], [0], [1], [0, 0, 1, 1], [], []>} : vector<48x128xf32>, vector<128x128xf32>, vector<48x128xf32> -> vector<48x128xf32>
    %110 = arith.addf %106, %109 : vector<48x128xf32>
    %c1_44 = arith.constant 1 : index
    %c0_45 = arith.constant 0 : index
    %c0_46 = arith.constant 0 : index
    %111 = vector.load %arg6[%c1_44, %c0_45, %c0_46] : memref<3x128x128xf32, #tpu.memory_space<vmem>>, vector<1x128x128xf32>
    %112 = vector.shape_cast %111 : vector<1x128x128xf32> to vector<128x128xf32>
    %cst_47 = arith.constant dense<0.000000e+00> : vector<48x128xf32>
    %113 = tpu.matmul %94, %112, %cst_47 {dimension_numbers = #tpu.dot_dimension_numbers<[1], [0], [0], [1], [0, 0, 1, 1], [], []>} : vector<48x128xf32>, vector<128x128xf32>, vector<48x128xf32> -> vector<48x128xf32>
    %114 = arith.addf %110, %113 : vector<48x128xf32>
    %c2_48 = arith.constant 2 : index
    %c0_49 = arith.constant 0 : index
    %c0_50 = arith.constant 0 : index
    %115 = vector.load %arg6[%c2_48, %c0_49, %c0_50] : memref<3x128x128xf32, #tpu.memory_space<vmem>>, vector<1x128x128xf32>
    %116 = vector.shape_cast %115 : vector<1x128x128xf32> to vector<128x128xf32>
    %cst_51 = arith.constant dense<0.000000e+00> : vector<48x128xf32>
    %117 = tpu.matmul %103, %116, %cst_51 {dimension_numbers = #tpu.dot_dimension_numbers<[1], [0], [0], [1], [0, 0, 1, 1], [], []>} : vector<48x128xf32>, vector<128x128xf32>, vector<48x128xf32> -> vector<48x128xf32>
    %118 = arith.addf %114, %117 : vector<48x128xf32>
    %119 = vector.broadcast %0 : vector<48x1xf32> to vector<48x128xf32>
    %120 = arith.mulf %118, %119 : vector<48x128xf32>
    %cst_52 = arith.constant dense<0.000000e+00> : vector<128xf32>
    %121 = vector.multi_reduction <add>, %120, %cst_52 [0] : vector<48x128xf32> to vector<128xf32>
    %122 = vector.shape_cast %121 : vector<128xf32> to vector<1x128xf32>
    %123 = arith.mulf %120, %118 : vector<48x128xf32>
    %cst_53 = arith.constant dense<0.000000e+00> : vector<128xf32>
    %124 = vector.multi_reduction <add>, %123, %cst_53 [0] : vector<48x128xf32> to vector<128xf32>
    %125 = vector.shape_cast %124 : vector<128xf32> to vector<1x128xf32>
    %126 = tpu.concatenate %122, %125 in 0 : vector<1x128xf32>, vector<1x128xf32> -> vector<2x128xf32>
    %cst_54 = arith.constant dense<0.000000e+00> : vector<2x128xf32>
    %127 = tpu.matmul %126, %1, %cst_54 {dimension_numbers = #tpu.dot_dimension_numbers<[1], [0], [0], [1], [0, 0, 1, 1], [], []>} : vector<2x128xf32>, vector<128x128xf32>, vector<2x128xf32> -> vector<2x128xf32>
    %cst_55 = arith.constant 0.001953125 : f32
    %128 = vector.broadcast %cst_55 : f32 to vector<2x128xf32>
    %129 = arith.mulf %127, %128 : vector<2x128xf32>
    %130 = vector.extract_strided_slice %129 {offsets = [0, 0], sizes = [1, 128], strides = [1, 1]} : vector<2x128xf32> to vector<1x128xf32>
    %131 = vector.extract_strided_slice %129 {offsets = [1, 0], sizes = [1, 128], strides = [1, 1]} : vector<2x128xf32> to vector<1x128xf32>
    %132 = vector.extract_strided_slice %2 {offsets = [4, 0], sizes = [1, 128], strides = [1, 1]} : vector<6x128xf32> to vector<1x128xf32>
    %133 = vector.extract_strided_slice %2 {offsets = [5, 0], sizes = [1, 128], strides = [1, 1]} : vector<6x128xf32> to vector<1x128xf32>
    %134 = arith.mulf %130, %130 : vector<1x128xf32>
    %135 = arith.subf %131, %134 : vector<1x128xf32>
    %cst_56 = arith.constant 9.99999974E-6 : f32
    %136 = vector.broadcast %cst_56 : f32 to vector<1x128xf32>
    %137 = arith.addf %135, %136 : vector<1x128xf32>
    %138 = math.rsqrt %137 : vector<1x128xf32>
    %139 = arith.mulf %138, %132 : vector<1x128xf32>
    %140 = arith.mulf %130, %139 : vector<1x128xf32>
    %141 = arith.subf %133, %140 : vector<1x128xf32>
    %142 = vector.broadcast %139 : vector<1x128xf32> to vector<48x128xf32>
    %143 = arith.mulf %118, %142 : vector<48x128xf32>
    %144 = vector.broadcast %141 : vector<1x128xf32> to vector<48x128xf32>
    %145 = arith.addf %143, %144 : vector<48x128xf32>
    %146 = math.tanh %145 : vector<48x128xf32>
    %cst_57 = arith.constant 1.000000e+00 : f32
    %147 = vector.broadcast %cst_57 : f32 to vector<48x128xf32>
    %148 = arith.subf %147, %93 : vector<48x128xf32>
    %149 = arith.mulf %148, %13 : vector<48x128xf32>
    %150 = arith.mulf %93, %146 : vector<48x128xf32>
    %151 = arith.addf %149, %150 : vector<48x128xf32>
    %c0_58 = arith.constant 0 : index
    %c0_59 = arith.constant 0 : index
    %152 = vector.load %arg11[%c0_58, %c0_59] : memref<48x128xf32, #tpu.memory_space<vmem>>, vector<48x128xf32>
    tpu.vector_store %arg11[%c0_58, %c0_59], %151 {strides = array<i32>} : memref<48x128xf32, #tpu.memory_space<vmem>>, vector<48x128xf32>,
    %c0_60 = arith.constant 0 : index
    %c0_61 = arith.constant 0 : index
    %153 = vector.load %arg12[%c0_60, %c0_61] : memref<48x128xf32, #tpu.memory_space<vmem>>, vector<48x128xf32>
    tpu.vector_store %arg12[%c0_60, %c0_61], %94 {strides = array<i32>} : memref<48x128xf32, #tpu.memory_space<vmem>>, vector<48x128xf32>,
    return
  }
}

</mosaic_0001>

<bundles_post_ra>
// kernel: conv_gru_cell.1
= control target key start
LH: loop header
LB: loop body
LE: loop exit
PB: predicated region body
PF: predicated region fallthrough
CT: control target
= control target key end

     0   :  { %v4125_v3 = vmov 0.0   ;;  %v2528_v4 = vmov 0   ;;  %vm147_vm0 = vcmask 261120   ;;  %vm374_vm1 = vcmask 1046528   ;;  %s4112_s2 = inlined_call_operand.vmem [shape: f32[288,256], index: 2, kind: input, shape index: {}]   ;;  %s4113_s0 = inlined_call_operand.vmem [shape: f32[26,288], index: 0, kind: input, shape index: {}]   ;;  %s4114_s10 = inlined_call_operand.vmem [shape: f32[26,1], index: 10, kind: input, shape index: {}]   ;;  %s4115_s9 = inlined_call_operand.vmem [shape: f32[48,1], index: 9, kind: input, shape index: {}]   ;;  %s4116_s5 = inlined_call_operand.vmem [shape: f32[3,128,256], index: 5, kind: input, shape index: {}]   ;;  %s4117_s3 = inlined_call_operand.vmem [shape: f32[192,256], index: 3, kind: input, shape index: {}]   ;;  %s4118_s1 = inlined_call_operand.vmem [shape: f32[48,192], index: 1, kind: input, shape index: {}]   ;;  %s4119_s8 = inlined_call_operand.vmem [shape: f32[128,128], index: 8, kind: input, shape index: {}]   ;;  %s4120_s4 = inlined_call_operand.vmem [shape: f32[192,128], index: 4, kind: input, shape index: {}]   ;;  %s4121_s6 = inlined_call_operand.vmem [shape: f32[3,128,128], index: 6, kind: input, shape index: {}]   ;;  %s4122_s7 = inlined_call_operand.vmem [shape: f32[6,128], index: 7, kind: input, shape index: {}]   ;;  %s4123_s12 = inlined_call_operand.vmem [shape: f32[48,128], index: 12, kind: output, shape index: {1}]   ;;  %s4124_s11 = inlined_call_operand.vmem [shape: f32[48,128], index: 11, kind: output, shape index: {0}]  }
   0x1   :  { %v106_v0 = vld [vmem:[%s4112_s2 + $0xf8] sm:$0xff]  ;;  %v105_v1 = vld [vmem:[%s4112_s2 + $0xf0] sm:$0xff]  ;;  %v104_v2 = vld [vmem:[%s4112_s2 + $0xe8] sm:$0xff]  ;;  %313 = vmatprep.mubr.f32.mxu1 %v4125_v3  ;;  %2445 = vset.pattern.permute.xlu0 %v2528_v4  ;;  %vm459_vm2 = vcmask 1045504   ;;  %vm603_vm3 = vcmask 523264   ;;  %vm2529_vm4 = vmmov 0  }
   0x2   :  { %160 = vmatprep.subr.mxu0 %v106_v0  ;;  %v103_v5 = vld [vmem:[%s4112_s2 + $0xe0] sm:$0xff]  ;;  %2446 = vset.pattern.permute.xlu1 %v2528_v4  ;;  %v102_v6 = vld [vmem:[%s4112_s2 + $0xd8] sm:$0xff]  ;;  %v101_v7 = vld [vmem:[%s4112_s2 + $0xd0] sm:$0xff]  ;;  %vm1113_vm5 = vcmask 1040384   ;;  %vm1115_vm6 = vcmask 1041408   ;;  %vm1117_vm7 = vcmask 1042432  }
   0x3   :  { %161 = vmatpush1.msra.mxu0 %v105_v1  ;;  %v100_v8 = vld [vmem:[%s4112_s2 + $0xc8] sm:$0xff]  ;;  %v99_v9 = vld [vmem:[%s4112_s2 + $0xc0] sm:$0xff]  ;;  %v98_v10 = vld [vmem:[%s4112_s2 + $0xb8] sm:$0xff] }
   0x4   :  { %162 = vmatprep.subr.mxu0 %v104_v2  ;;  %v97_v11 = vld [vmem:[%s4112_s2 + $0xb0] sm:$0xff]  ;;  %v96_v12 = vld [vmem:[%s4112_s2 + $0xa8] sm:$0xff]  ;;  %v95_v13 = vld [vmem:[%s4112_s2 + $0xa0] sm:$0xff] }
   0x5   :  { %163 = vmatpush1.msra.mxu0 %v103_v5  ;;  %v94_v14 = vld [vmem:[%s4112_s2 + $0x98] sm:$0xff]  ;;  %v93_v15 = vld [vmem:[%s4112_s2 + $0x90] sm:$0xff]  ;;  %v92_v16 = vld [vmem:[%s4112_s2 + $0x88] sm:$0xff] }
   0x6   :  { %164 = vmatprep.subr.mxu0 %v102_v6  ;;  %v91_v17 = vld [vmem:[%s4112_s2 + $0x80] sm:$0xff]  ;;  %v90_v18 = vld [vmem:[%s4112_s2 + $0x78] sm:$0xff]  ;;  %v89_v19 = vld [vmem:[%s4112_s2 + $0x70] sm:$0xff] }
   0x7   :  { %165 = vmatpush1.msra.mxu0 %v101_v7  ;;  %v88_v20 = vld [vmem:[%s4112_s2 + $0x68] sm:$0xff]  ;;  %v87_v21 = vld [vmem:[%s4112_s2 + $0x60] sm:$0xff]  ;;  %v86_v22 = vld [vmem:[%s4112_s2 + $0x58] sm:$0xff] }
   0x8   :  { %166 = vmatprep.subr.mxu0 %v100_v8  ;;  %v146_v23 = vld [vmem:[%s4112_s2 + $0x238] sm:$0xff]  ;;  %v85_v24 = vld [vmem:[%s4112_s2 + $0x50] sm:$0xff]  ;;  %v144_v26 = vld [vmem:[%s4112_s2 + $0x228] sm:$0xff] }
   0x9   :  { %167 = vmatpush1.msra.mxu0 %v99_v9  ;;  %273 = vmatprep.subr.mxu1 %v146_v23  ;;  %v145_v25 = vld [vmem:[%s4112_s2 + $0x230] sm:$0xff]  ;;  %v84_v27 = vld [vmem:[%s4112_s2 + $0x48] sm:$0xff]  ;;  %v143_v28 = vld [vmem:[%s4112_s2 + $0x220] sm:$0xff] }
   0xa   :  { %168 = vmatprep.subr.mxu0 %v98_v10  ;;  %274 = vmatpush1.msra.mxu1 %v145_v25  ;;  %v83_v29 = vld [vmem:[%s4112_s2 + $0x40] sm:$0xff]  ;;  %v142_v30 = vld [vmem:[%s4112_s2 + $0x218] sm:$0xff]  ;;  %v141_v31 = vld [vmem:[%s4112_s2 + $0x210] sm:$0xff] }
   0xb   :  { %169 = vmatpush1.msra.mxu0 %v97_v11  ;;  %275 = vmatprep.subr.mxu1 %v144_v26  ;;  %v82_v32 = vld [vmem:[%s4112_s2 + $0x38] sm:$0xff]  ;;  %v140_v33 = vld [vmem:[%s4112_s2 + $0x208] sm:$0xff]  ;;  %v81_v34 = vld [vmem:[%s4112_s2 + $0x30] sm:$0xff] }
   0xc   :  { %170 = vmatprep.subr.mxu0 %v96_v12  ;;  %276 = vmatpush1.msra.mxu1 %v143_v28  ;;  %v139_v35 = vld [vmem:[%s4112_s2 + $0x200] sm:$0xff]  ;;  %v80_v36 = vld [vmem:[%s4112_s2 + $0x28] sm:$0xff]  ;;  %v65_v37 = vld [vmem:[%s4113_s0 + $0x10] sm:$0xff] }
   0xd   :  { %171 = vmatpush1.msra.mxu0 %v95_v13  ;;  %277 = vmatprep.subr.mxu1 %v142_v30  ;;  %v79_v38 = vld [vmem:[%s4112_s2 + $0x20] sm:$0xff]  ;;  %v64_v39 = vld [vmem:[%s4113_s0 + $0x8] sm:$0xff]  ;;  %v78_v40 = vld [vmem:[%s4112_s2 + $0x18] sm:$0xff] }
   0xe   :  { %172 = vmatprep.subr.mxu0 %v94_v14  ;;  %278 = vmatpush1.msra.mxu1 %v141_v31  ;;  %v77_v41 = vld [vmem:[%s4112_s2 + $0x10] sm:$0xff]  ;;  %v76_v42 = vld [vmem:[%s4112_s2 + $0x8] sm:$0xff]  ;;  %v338_v44 = vld [vmem:[%s4114_s10] sm:$0xff] }
   0xf   :  { %173 = vmatpush1.msra.mxu0 %v93_v15  ;;  %279 = vmatprep.subr.mxu1 %v140_v33  ;;  %v68_v43 = vld [vmem:[%s4113_s0 + $0x28] sm:$0xff]  ;;  %v75_v45 = vld [vmem:[%s4112_s2] sm:$0xff]  ;;  %v138_v46 = vld [vmem:[%s4112_s2 + $0x1f8] sm:$0xff] }
  0x10   :  { %174 = vmatprep.subr.mxu0 %v92_v16  ;;  %280 = vmatpush1.msra.mxu1 %v139_v35  ;;  %v340_v47 = vld [vmem:[%s4114_s10 + $0x10] sm:$0xff]  ;;  %v339_v49 = vld [vmem:[%s4114_s10 + $0x8] sm:$0xff]  ;;  %v71_v51 = vld [vmem:[%s4113_s0 + $0x40] sm:$0xff] }
  0x11   :  { %175 = vmatpush1.msra.mxu0 %v91_v17  ;;  %2022 = vmatmul.mubr.msk.f32.vlgmr.msra.gmra.mxu1 %vm147_vm0, %v65_v37  ;;  %v137_v48 = vld [vmem:[%s4112_s2 + $0x1f0] sm:$0xff]  ;;  %v136_v50 = vld [vmem:[%s4112_s2 + $0x1e8] sm:$0xff]  ;;  %v135_v52 = vld [vmem:[%s4112_s2 + $0x1e0] sm:$0xff] }
  0x12   :  { %176 = vmatprep.subr.mxu0 %v90_v18  ;;  %224 = vmatprep.mubr.f32.mxu0 %v64_v39  ;;  %v134_v53 = vld [vmem:[%s4112_s2 + $0x1d8] sm:$0xff]  ;;  %v133_v55 = vld [vmem:[%s4112_s2 + $0x1d0] sm:$0xff]  ;;  %v40_v56 = vld [vmem:[%s4115_s9] sm:$0xff] }
  0x13   :  { %177 = vmatpush1.msra.mxu0 %v89_v19  ;;  %319 = vmatprep.mubr.f32.mxu1 %v4125_v3  ;;  %v341_v54 = vld [vmem:[%s4114_s10 + $0x18] sm:$0x3]  ;;  %v132_v57 = vld [vmem:[%s4112_s2 + $0x1c8] sm:$0xff]  ;;  %v131_v59 = vld [vmem:[%s4112_s2 + $0x1c0] sm:$0xff] }
  0x14   :  { %178 = vmatprep.subr.mxu0 %v88_v20  ;;  %344 = vperm.xlu0 %2445, %v338_v44   ;;  %v74_v58 = vld [vmem:[%s4113_s0 + $0x58] sm:$0x3]  ;;  %v41_v62 = vld [vmem:[%s4115_s9 + $0x8] sm:$0xff]  ;;  %v129_v63 = vld [vmem:[%s4112_s2 + $0x1b0] sm:$0xff] }
  0x15   :  { %179 = vmatpush1.msra.mxu0 %v87_v21  ;;  %2023 = vmatmul.mubr.msk.f32.gmra.mxu1 %vm147_vm0, %v68_v43  ;;  %v501_v60 = vld [vmem:[%s4116_s5 + $0xf8] sm:$0xff]  ;;  %v42_v0 = vld [vmem:[%s4115_s9 + $0x10] sm:$0xff]  ;;  %v128_v1 = vld [vmem:[%s4112_s2 + $0x1a8] sm:$0xff] }
  0x16   :  { %180 = vmatprep.subr.mxu0 %v86_v22  ;;  %325 = vmatprep.mubr.f32.mxu1 %v4125_v3  ;;  %v130_v61 = vld [vmem:[%s4112_s2 + $0x1b8] sm:$0xff]  ;;  %v500_v2 = vld [vmem:[%s4116_s5 + $0xf0] sm:$0xff]  ;;  %v127_v4 = vld [vmem:[%s4112_s2 + $0x1a0] sm:$0xff] }
  0x17   :  { %181 = vmatpush1.msra.mxu0 %v85_v24  ;;  %354 = vperm.xlu1 %2446, %v340_v47   ;;  %v499_v5 = vld [vmem:[%s4116_s5 + $0xe8] sm:$0xff]  ;;  %v126_v6 = vld [vmem:[%s4112_s2 + $0x198] sm:$0xff]  ;;  %v125_v8 = vld [vmem:[%s4112_s2 + $0x190] sm:$0xff] }
  0x18   :  { %182 = vmatprep.subr.mxu0 %v84_v27  ;;  %349 = vperm.xlu0 %2445, %v339_v49   ;;  %v43_v7 = vld [vmem:[%s4115_s9 + $0x18] sm:$0xff]  ;;  %v44_v9 = vld [vmem:[%s4115_s9 + $0x20] sm:$0xff]  ;;  %v124_v10 = vld [vmem:[%s4112_s2 + $0x188] sm:$0xff] }
  0x19   :  { %183 = vmatpush1.msra.mxu0 %v83_v29  ;;  %2024 = vmatmul.mubr.msk.f32.gmra.mxu1 %vm147_vm0, %v71_v51  ;;  %v498_v11 = vld [vmem:[%s4116_s5 + $0xe0] sm:$0xff]  ;;  %v497_v13 = vld [vmem:[%s4116_s5 + $0xd8] sm:$0xff]  ;;  %v45_v15 = vld [vmem:[%s4115_s9 + $0x28] sm:$0xff] }
  0x1a   :  { %184 = vmatprep.subr.mxu0 %v82_v32  ;;  %331 = vmatprep.mubr.f32.mxu1 %v4125_v3  ;;  %v123_v12 = vld [vmem:[%s4112_s2 + $0x180] sm:$0xff]  ;;  %v122_v14 = vld [vmem:[%s4112_s2 + $0x178] sm:$0xff]  ;;  %v121_v16 = vld [vmem:[%s4112_s2 + $0x170] sm:$0xff] }
  0x1b   :  { %185 = vmatpush1.msra.mxu0 %v81_v34  ;;  %359 = vperm.xlu1 %2446, %v341_v54   ;;  %v496_v17 = vld [vmem:[%s4116_s5 + $0xd0] sm:$0xff]  ;;  %v120_v18 = vld [vmem:[%s4112_s2 + $0x168] sm:$0xff]  ;;  %v119_v20 = vld [vmem:[%s4112_s2 + $0x160] sm:$0xff] }
  0x1c   :  { %186 = vmatprep.subr.mxu0 %v80_v36  ;;  %1017 = vperm.xlu0 %2445, %v40_v56   ;;  %v495_v19 = vld [vmem:[%s4116_s5 + $0xc8] sm:$0xff]  ;;  %v494_v21 = vld [vmem:[%s4116_s5 + $0xc0] sm:$0xff]  ;;  %v118_v22 = vld [vmem:[%s4112_s2 + $0x158] sm:$0xff] }
  0x1d   :  { %187 = vmatpush1.msra.mxu0 %v79_v38  ;;  %2025 = vmatmul.mubr.msk.f32.gmra.mxu1 %vm147_vm0, %v74_v58  ;;  %v493_v23 = vld [vmem:[%s4116_s5 + $0xb8] sm:$0xff]  ;;  %v117_v24 = vld [vmem:[%s4112_s2 + $0x150] sm:$0xff]  ;;  %v116_v26 = vld [vmem:[%s4112_s2 + $0x148] sm:$0xff] }
  0x1e   :  { %188 = vmatprep.subr.mxu0 %v78_v40  ;;  %502 = vmatprep.subr.mxu1 %v501_v60  ;;  %v492_v25 = vld [vmem:[%s4116_s5 + $0xb0] sm:$0xff]  ;;  %v491_v27 = vld [vmem:[%s4116_s5 + $0xa8] sm:$0xff]  ;;  %v115_v28 = vld [vmem:[%s4112_s2 + $0x140] sm:$0xff] }
  0x1f   :  { %189 = vmatpush1.msra.mxu0 %v77_v41  ;;  %1022 = vperm.xlu1 %2446, %v41_v62   ;;  %v490_v29 = vld [vmem:[%s4116_s5 + $0xa0] sm:$0xff]  ;;  %v114_v30 = vld [vmem:[%s4112_s2 + $0x138] sm:$0xff]  ;;  %v113_v32 = vld [vmem:[%s4112_s2 + $0x130] sm:$0xff] }
  0x20   :  { %190 = vmatprep.subr.mxu0 %v76_v42  ;;  %1027 = vperm.xlu0 %2445, %v42_v0   ;;  %v489_v31 = vld [vmem:[%s4116_s5 + $0x98] sm:$0xff]  ;;  %v488_v33 = vld [vmem:[%s4116_s5 + $0x90] sm:$0xff]  ;;  %v112_v34 = vld [vmem:[%s4112_s2 + $0x128] sm:$0xff] }
  0x21   :  { %191 = vmatpush1.msra.mxu0 %v75_v45  ;;  %503 = vmatpush1.msra.mxu1 %v500_v2  ;;  %v487_v35 = vld [vmem:[%s4116_s5 + $0x88] sm:$0xff]  ;;  %v111_v36 = vld [vmem:[%s4112_s2 + $0x120] sm:$0xff]  ;;  %v110_v38 = vld [vmem:[%s4112_s2 + $0x118] sm:$0xff] }
  0x22   :  { %192 = vmatprep.subr.mxu0 %v138_v46  ;;  %504 = vmatprep.subr.mxu1 %v499_v5  ;;  %v486_v37 = vld [vmem:[%s4116_s5 + $0x80] sm:$0xff]  ;;  %v485_v39 = vld [vmem:[%s4116_s5 + $0x78] sm:$0xff]  ;;  %v109_v40 = vld [vmem:[%s4112_s2 + $0x110] sm:$0xff] }
  0x23   :  { %193 = vmatpush2.msra.mxu0 %v137_v48  ;;  %1032 = vperm.xlu1 %2446, %v43_v7   ;;  %v484_v41 = vld [vmem:[%s4116_s5 + $0x70] sm:$0xff]  ;;  %v108_v42 = vld [vmem:[%s4112_s2 + $0x108] sm:$0xff]  ;;  %v107_v44 = vld [vmem:[%s4112_s2 + $0x100] sm:$0xff] }
  0x24   :  { %194 = vmatprep.subr.mxu0 %v136_v50  ;;  %1037 = vperm.xlu0 %2445, %v44_v9   ;;  %v483_v43 = vld [vmem:[%s4116_s5 + $0x68] sm:$0xff]  ;;  %v482_v45 = vld [vmem:[%s4116_s5 + $0x60] sm:$0xff]  ;;  %v2063_v47 = vld [vmem:[%s4116_s5 + $0x1f8] sm:$0xff] }
  0x25   :  { %195 = vmatpush2.msra.mxu0 %v135_v52  ;;  %505 = vmatpush1.msra.mxu1 %v498_v11  ;;  %v63_v46 = vld [vmem:[%s4113_s0] sm:$0xff]  ;;  %v2062_v49 = vld [vmem:[%s4116_s5 + $0x1f0] sm:$0xff]  ;;  %v2061_v50 = vld [vmem:[%s4116_s5 + $0x1e8] sm:$0xff] }
  0x26   :  { %196 = vmatprep.subr.mxu0 %v134_v53  ;;  %506 = vmatprep.subr.mxu1 %v497_v13  ;;  %v67_v48 = vld [vmem:[%s4113_s0 + $0x20] sm:$0xff]  ;;  %v481_v51 = vld [vmem:[%s4116_s5 + $0x58] sm:$0xff]  ;;  %v480_v53 = vld [vmem:[%s4116_s5 + $0x50] sm:$0xff] }
  0x27   :  { %197 = vmatpush2.msra.mxu0 %v133_v55  ;;  %1042 = vperm.xlu1 %2446, %v45_v15   ;;  %v2060_v52 = vld [vmem:[%s4116_s5 + $0x1e0] sm:$0xff]  ;;  %v66_v54 = vld [vmem:[%s4113_s0 + $0x18] sm:$0xff]  ;;  %v2057_v58 = vld [vmem:[%s4116_s5 + $0x1c8] sm:$0xff] }
  0x28   :  { %198 = vmatprep.subr.mxu0 %v132_v57  ;;  %507 = vmatpush1.msra.mxu1 %v496_v17  ;;  %v2059_v55 = vld [vmem:[%s4116_s5 + $0x1d8] sm:$0xff]  ;;  %v2058_v57 = vld [vmem:[%s4116_s5 + $0x1d0] sm:$0xff]  ;;  %v2056_v60 = vld [vmem:[%s4116_s5 + $0x1c0] sm:$0xff] }
  0x29   :  { %199 = vmatpush2.msra.mxu0 %v131_v59  ;;  %508 = vmatprep.subr.mxu1 %v495_v19  ;;  %v70_v56 = vld [vmem:[%s4113_s0 + $0x38] sm:$0xff]  ;;  %v479_v59 = vld [vmem:[%s4116_s5 + $0x48] sm:$0xff]  ;;  %v69_v62 = vld [vmem:[%s4113_s0 + $0x30] sm:$0xff] }
  0x2a   :  { %200 = vmatprep.subr.mxu0 %v130_v61  ;;  %509 = vmatpush1.msra.mxu1 %v494_v21  ;;  %v478_v61 = vld [vmem:[%s4116_s5 + $0x40] sm:$0xff]  ;;  %v73_v0 = vld [vmem:[%s4113_s0 + $0x50] sm:$0x3]  ;;  %v2053_v2 = vld [vmem:[%s4116_s5 + $0x1a8] sm:$0xff] }
  0x2b   :  { %201 = vmatpush2.msra.mxu0 %v129_v63  ;;  %510 = vmatprep.subr.mxu1 %v493_v23  ;;  %v2055_v63 = vld [vmem:[%s4116_s5 + $0x1b8] sm:$0xff]  ;;  %v72_v5 = vld [vmem:[%s4113_s0 + $0x48] sm:$0x3]  ;;  %v2050_v7 = vld [vmem:[%s4116_s5 + $0x190] sm:$0xff] }
  0x2c   :  { %202 = vmatprep.subr.mxu0 %v128_v1  ;;  %511 = vmatpush1.msra.mxu1 %v492_v25  ;;  %v2054_v1 = vld [vmem:[%s4116_s5 + $0x1b0] sm:$0xff]  ;;  %v2048_v9 = vld [vmem:[%s4116_s5 + $0x180] sm:$0xff]  ;;  %v2045_v13 = vld [vmem:[%s4116_s5 + $0x168] sm:$0xff] }
  0x2d   :  { %203 = vmatpush2.msra.mxu0 %v127_v4  ;;  %512 = vmatprep.subr.mxu1 %v491_v27  ;;  %v2052_v4 = vld [vmem:[%s4116_s5 + $0x1a0] sm:$0xff]  ;;  %v2046_v11 = vld [vmem:[%s4116_s5 + $0x170] sm:$0xff]  ;;  %v2043_v17 = vld [vmem:[%s4116_s5 + $0x158] sm:$0xff] }
  0x2e   :  { %204 = vmatprep.subr.mxu0 %v126_v6  ;;  %513 = vmatpush1.msra.mxu1 %v490_v29  ;;  %v2051_v6 = vld [vmem:[%s4116_s5 + $0x198] sm:$0xff]  ;;  %v2044_v15 = vld [vmem:[%s4116_s5 + $0x160] sm:$0xff]  ;;  %v2042_v19 = vld [vmem:[%s4116_s5 + $0x150] sm:$0xff] }
  0x2f   :  { %205 = vmatpush2.msra.mxu0 %v125_v8  ;;  %514 = vmatprep.subr.mxu1 %v489_v31  ;;  %v2049_v8 = vld [vmem:[%s4116_s5 + $0x188] sm:$0xff]  ;;  %v2040_v23 = vld [vmem:[%s4116_s5 + $0x140] sm:$0xff]  ;;  %v2039_v25 = vld [vmem:[%s4116_s5 + $0x138] sm:$0xff] }
  0x30   :  { %206 = vmatprep.subr.mxu0 %v124_v10  ;;  %515 = vmatpush1.msra.mxu1 %v488_v33  ;;  %v2047_v10 = vld [vmem:[%s4116_s5 + $0x178] sm:$0xff]  ;;  %v2041_v21 = vld [vmem:[%s4116_s5 + $0x148] sm:$0xff]  ;;  %v2038_v27 = vld [vmem:[%s4116_s5 + $0x130] sm:$0xff] }
  0x31   :  { %207 = vmatpush2.msra.mxu0 %v123_v12  ;;  %516 = vmatprep.subr.mxu1 %v487_v35  ;;  %v477_v12 = vld [vmem:[%s4116_s5 + $0x38] sm:$0xff]  ;;  %v2037_v29 = vld [vmem:[%s4116_s5 + $0x128] sm:$0xff]  ;;  %vm2108_vm8 = vmneg %vm1113_vm5 }
  0x32   :  { %208 = vmatprep.subr.mxu0 %v122_v14  ;;  %517 = vmatpush1.msra.mxu1 %v486_v37  ;;  %v476_v14 = vld [vmem:[%s4116_s5 + $0x30] sm:$0xff]  ;;  %v2035_v31 = vld [vmem:[%s4116_s5 + $0x118] sm:$0xff]  ;;  %v2033_v33 = vld [vmem:[%s4116_s5 + $0x108] sm:$0xff] }
  0x33   :  { %209 = vmatpush2.msra.mxu0 %v121_v16  ;;  %518 = vmatprep.subr.mxu1 %v485_v39  ;;  %v475_v16 = vld [vmem:[%s4116_s5 + $0x28] sm:$0xff] }
  0x34   :  { %210 = vmatprep.subr.mxu0 %v120_v18  ;;  %519 = vmatpush1.msra.mxu1 %v484_v41  ;;  %v474_v18 = vld [vmem:[%s4116_s5 + $0x20] sm:$0xff] }
  0x35   :  { %211 = vmatpush2.msra.mxu0 %v119_v20  ;;  %520 = vmatprep.subr.mxu1 %v483_v43  ;;  %v473_v20 = vld [vmem:[%s4116_s5 + $0x18] sm:$0xff] }
  0x36   :  { %212 = vmatprep.subr.mxu0 %v118_v22  ;;  %521 = vmatpush1.msra.mxu1 %v482_v45  ;;  %v472_v22 = vld [vmem:[%s4116_s5 + $0x10] sm:$0xff] }
  0x37   :  { %213 = vmatpush2.msra.mxu0 %v117_v24  ;;  %522 = vmatprep.subr.mxu1 %v481_v51  ;;  %v471_v24 = vld [vmem:[%s4116_s5 + $0x8] sm:$0xff] }
  0x38   :  { %214 = vmatprep.subr.mxu0 %v116_v26  ;;  %523 = vmatpush1.msra.mxu1 %v480_v53  ;;  %v470_v26 = vld [vmem:[%s4116_s5] sm:$0xff]  ;;  %v440_v53 = vld [vmem:[%s4117_s3 + $0xe8] sm:$0xff] }
  0x39   :  { %215 = vmatpush2.msra.mxu0 %v115_v28  ;;  %524 = vmatprep.subr.mxu1 %v479_v59  ;;  %v442_v28 = vld [vmem:[%s4117_s3 + $0xf8] sm:$0xff] }
  0x3a   :  { %216 = vmatprep.subr.mxu0 %v114_v30  ;;  %525 = vmatpush1.msra.mxu1 %v478_v61  ;;  %v2036_v30 = vld [vmem:[%s4116_s5 + $0x120] sm:$0xff] }
  0x3b   :  { %217 = vmatpush2.msra.mxu0 %v113_v32  ;;  %566 = vmatprep.mubr.f32.mxu1 %v4125_v3  ;;  %v2034_v32 = vld [vmem:[%s4116_s5 + $0x110] sm:$0xff] }
  0x3c   :  { %218 = vmatprep.subr.mxu0 %v112_v34  ;;  %526 = vmatprep.subr.mxu1 %v477_v12  ;;  %v2032_v34 = vld [vmem:[%s4116_s5 + $0x100] sm:$0xff] }
  0x3d   :  { %219 = vmatpush2.msra.mxu0 %v111_v36  ;;  %527 = vmatpush1.msra.mxu1 %v476_v14 }
  0x3e   :  { %220 = vmatprep.subr.mxu0 %v110_v38  ;;  %528 = vmatprep.subr.mxu1 %v475_v16 }
  0x3f   :  { %221 = vmatpush2.msra.mxu0 %v109_v40  ;;  %529 = vmatpush1.msra.mxu1 %v474_v18 }
  0x40   :  { %222 = vmatprep.subr.mxu0 %v108_v42  ;;  %530 = vmatprep.subr.mxu1 %v473_v20  ;;  %v432_v20 = vld [vmem:[%s4117_s3 + $0xa8] sm:$0xff] }
  0x41   :  { %223 = vmatpush2.msra.mxu0 %v107_v44  ;;  %531 = vmatpush1.msra.mxu1 %v472_v22 }
  0x42   :  { %225 = vmatmul.mubr.f32.vlgmr.msra.gmra.mxu0 %v63_v46  ;;  %756 = vmatprep.subr.mxu0 %v2063_v47 }
  0x43   :  { %230 = vmatprep.mubr.f32.mxu0 %v67_v48  ;;  %757 = vmatpush1.msra.mxu0 %v2062_v49 }
  0x44   :  { %758 = vmatprep.subr.mxu0 %v2061_v50  ;;  %532 = vmatprep.subr.mxu1 %v471_v24  ;;  %v441_v50 = vld [vmem:[%s4117_s3 + $0xf0] sm:$0xff] }
  0x45   :  { %759 = vmatpush1.msra.mxu0 %v2060_v52  ;;  %533 = vmatpush1.msra.mxu1 %v470_v26  ;;  %v430_v26 = vld [vmem:[%s4117_s3 + $0x98] sm:$0xff] }
  0x46   :  { %231 = vmatmul.mubr.f32.gmra.mxu0 %v66_v54  ;;  %760 = vmatprep.subr.mxu0 %v2059_v55 }
  0x47   :  { %236 = vmatprep.mubr.f32.mxu0 %v70_v56  ;;  %761 = vmatpush1.msra.mxu0 %v2058_v57  ;;  %v439_v57 = vld [vmem:[%s4117_s3 + $0xe0] sm:$0xff] }
  0x48   :  { %762 = vmatprep.subr.mxu0 %v2057_v58  ;;  %622 = vmatprep.subr.mxu1 %v442_v28 }
  0x49   :  { %763 = vmatpush1.msra.mxu0 %v2056_v60  ;;  %v438_v60 = vld [vmem:[%s4117_s3 + $0xd8] sm:$0xff] }
  0x4a   :  { %237 = vmatmul.mubr.f32.gmra.mxu0 %v69_v62  ;;  %764 = vmatprep.subr.mxu0 %v2055_v63 }
  0x4b   :  { %242 = vmatprep.mubr.f32.mxu0 %v73_v0  ;;  %765 = vmatpush1.msra.mxu0 %v2054_v1  ;;  %v437_v1 = vld [vmem:[%s4117_s3 + $0xd0] sm:$0xff] }
  0x4c   :  { %766 = vmatprep.subr.mxu0 %v2053_v2 }
  0x4d   :  { %767 = vmatpush1.msra.mxu0 %v2052_v4 }
  0x4e   :  { %243 = vmatmul.mubr.f32.gmra.mxu0 %v72_v5  ;;  %768 = vmatprep.subr.mxu0 %v2051_v6  ;;  %v436_v6 = vld [vmem:[%s4117_s3 + $0xc8] sm:$0xff] }
  0x4f   :  { %769 = vmatpush1.msra.mxu0 %v2050_v7  ;;  %820 = vmatprep.mubr.f32.mxu0 %v4125_v3 }
  0x50   :  { %770 = vmatprep.subr.mxu0 %v2049_v8 }
  0x51   :  { %771 = vmatpush1.msra.mxu0 %v2048_v9 }
  0x52   :  { %772 = vmatprep.subr.mxu0 %v2047_v10  ;;  %v435_v10 = vld [vmem:[%s4117_s3 + $0xc0] sm:$0xff] }
  0x53   :  { %773 = vmatpush1.msra.mxu0 %v2046_v11 }
  0x54   :  { %774 = vmatprep.subr.mxu0 %v2045_v13  ;;  %v434_v13 = vld [vmem:[%s4117_s3 + $0xb8] sm:$0xff] }
  0x55   :  { %775 = vmatpush1.msra.mxu0 %v2044_v15 }
  0x56   :  { %776 = vmatprep.subr.mxu0 %v2043_v17 }
  0x57   :  { %777 = vmatpush1.msra.mxu0 %v2042_v19  ;;  %v433_v19 = vld [vmem:[%s4117_s3 + $0xb0] sm:$0xff] }
  0x58   :  { %778 = vmatprep.subr.mxu0 %v2041_v21 }
  0x59   :  { %779 = vmatpush1.msra.mxu0 %v2040_v23 }
  0x5a   :  { %780 = vmatprep.subr.mxu0 %v2039_v25  ;;  %v431_v25 = vld [vmem:[%s4117_s3 + $0xa0] sm:$0xff] }
  0x5b   :  { %781 = vmatpush1.msra.mxu0 %v2038_v27 }
  0x5c   :  { %782 = vmatprep.subr.mxu0 %v2037_v29 }
  0x5d   :  { %783 = vmatpush1.msra.mxu0 %v2036_v30  ;;  %v429_v30 = vld [vmem:[%s4117_s3 + $0x90] sm:$0xff] }
  0x5e   :  { %784 = vmatprep.subr.mxu0 %v2035_v31 }
  0x5f   :  { %785 = vmatpush1.msra.mxu0 %v2034_v32  ;;  %v428_v32 = vld [vmem:[%s4117_s3 + $0x88] sm:$0xff] }
  0x60   :  { %786 = vmatprep.subr.mxu0 %v2033_v33 }
  0x61   :  { %787 = vmatpush1.msra.mxu0 %v2032_v34 }
  0x62   :  { %2249 = vmatprep.subr.mxu0 %v4125_v3 }
  0x8f   :  { %v345_v39 = vpop.permute.xlu0 %344 }
  0x92   :  { %v355_v51 = vpop.permute.xlu1 %354 }
  0x93   :  { %v350_v47 = vpop.permute.xlu0 %349 }
  0x96   :  { %v360_v12 = vpop.permute.xlu1 %359 }
  0xd1   :  { %v315_v35 = vpop.f32.mrf.mxu1 }
  0xd3   :  { %v317_v36 = vpop.f32.mrf.mxu1 }
  0xd5   :  { %v321_v37 = vpop.f32.mrf.mxu1 }
  0xd7   :  { %v323_v38 = vpop.f32.mrf.mxu1 }
  0xd9   :  { %v327_v43 = vpop.f32.mrf.mxu1 }
  0xdb   :  { %v329_v54 = vpop.f32.mrf.mxu1 }
  0xdd   :  { %v333_v5 = vpop.f32.mrf.mxu1 }
  0xdf   :  { %v335_v22 = vpop.f32.mrf.mxu1 }
 0x102   :  { %v226_v40 = vpop.f32.mrf.mxu0 }
 0x103   :  { %v316_v41 = vadd.f32 %v315_v35, %v226_v40  ;;  %v427_v35 = vld [vmem:[%s4117_s3 + $0x80] sm:$0xff] }
 0x104   :  { %v228_v42 = vpop.f32.mrf.mxu0 }
 0x105   :  { %v318_v44 = vadd.f32 %v317_v36, %v228_v42  ;;  %v362_v45 = vmul.f32 %v345_v39, %v316_v41  ;;  %v424_v41 = vld [vmem:[%s4117_s3 + $0x68] sm:$0xff] }
 0x106   :  { %v232_v46 = vpop.f32.mrf.mxu0 }
 0x107   :  { %v3083_v48 = vmul.f32 %v345_v39, %v318_v44  ;;  %v322_v49 = vadd.f32 %v321_v37, %v232_v46  ;;  %v375_v58 = vrot.slane %v362_v45, 1  ;;  %v460_v2 = vrot.slane %v362_v45, 2  ;;  %v426_v37 = vld [vmem:[%s4117_s3 + $0x78] sm:$0xff]  ;;  %v425_v39 = vld [vmem:[%s4117_s3 + $0x70] sm:$0xff]  ;;  %v423_v44 = vld [vmem:[%s4117_s3 + $0x60] sm:$0xff] }
 0x108   :  { %v234_v52 = vpop.f32.mrf.mxu0  ;;  %v422_v45 = vld [vmem:[%s4117_s3 + $0x58] sm:$0xff]  ;;  %v421_v46 = vld [vmem:[%s4117_s3 + $0x50] sm:$0xff] }
 0x109   :  { %v364_v55 = vmul.f32 %v350_v47, %v322_v49  ;;  %v324_v56 = vadd.f32 %v323_v38, %v234_v52  ;;  %567 = vmatmul.mubr.f32.vlgmr.msra.gmra.mxu1 %v3083_v48  ;;  %v389_v38 = vrot.slane %v3083_v48, 1  ;;  %v420_v48 = vld [vmem:[%s4117_s3 + $0x48] sm:$0xff]  ;;  %v418_v52 = vld [vmem:[%s4117_s3 + $0x38] sm:$0xff] }
 0x10a   :  { %623 = vmatpush1.msra.mxu1 %v441_v50  ;;  %v238_v59 = vpop.f32.mrf.mxu0  ;;  %572 = vmatprep.mubr.f32.mxu1 %v4125_v3  ;;  %v419_v50 = vld [vmem:[%s4117_s3 + $0x40] sm:$0xff] }
 0x10b   :  { %v376_v61 = vrot.slane %v364_v55, 1  ;;  %v461_v62 = vrot.slane %v364_v55, 2  ;;  %v3099_v63 = vmul.f32 %v350_v47, %v324_v56  ;;  %v328_v0 = vadd.f32 %v327_v43, %v238_v59  ;;  %624 = vmatprep.subr.mxu1 %v440_v53  ;;  %v417_v53 = vld [vmem:[%s4117_s3 + $0x30] sm:$0xff]  ;;  %v416_v55 = vld [vmem:[%s4117_s3 + $0x28] sm:$0xff]  ;;  %v415_v56 = vld [vmem:[%s4117_s3 + $0x20] sm:$0xff] }
 0x10c   :  { %625 = vmatpush1.msra.mxu1 %v439_v57  ;;  %v240_v4 = vpop.f32.mrf.mxu0  ;;  %v414_v57 = vld [vmem:[%s4117_s3 + $0x18] sm:$0xff]  ;;  %v412_v59 = vld [vmem:[%s4117_s3 + $0x8] sm:$0xff] }
 0x10d   :  { %v366_v7 = vmul.f32 %v355_v51, %v328_v0  ;;  %v330_v8 = vadd.f32 %v329_v54, %v240_v4  ;;  %626 = vmatprep.subr.mxu1 %v438_v60  ;;  %573 = vmatmul.mubr.f32.gmra.mxu1 %v3099_v63  ;;  %v3109_v9 = vsel %vm374_vm1, %v375_v58, %v376_v61  ;;  %v390_v33 = vrot.slane %v3099_v63, 1  ;;  %v413_v58 = vld [vmem:[%s4117_s3 + $0x10] sm:$0xff]  ;;  %v411_v60 = vld [vmem:[%s4117_s3] sm:$0xff]  ;;  %v456_v63 = vld [vmem:[%s4117_s3 + $0x168] sm:$0xff] }
 0x10e   :  { %627 = vmatpush1.msra.mxu1 %v437_v1  ;;  %v244_v11 = vpop.f32.mrf.mxu0  ;;  %821 = vmatmul.mubr.f32.vlgmr.msra.gmra.mxu0 %v3109_v9  ;;  %v3119_v14 = vsel %vm459_vm2, %v460_v2, %v461_v62  ;;  %v455_v0 = vld [vmem:[%s4117_s3 + $0x160] sm:$0xff]  ;;  %v454_v1 = vld [vmem:[%s4117_s3 + $0x158] sm:$0xff]  ;;  %v453_v2 = vld [vmem:[%s4117_s3 + $0x150] sm:$0xff] }
 0x10f   :  { %v378_v15 = vrot.slane %v366_v7, 1  ;;  %v463_v16 = vrot.slane %v366_v7, 2  ;;  %v3121_v17 = vmul.f32 %v355_v51, %v330_v8  ;;  %v334_v18 = vadd.f32 %v333_v5, %v244_v11  ;;  %628 = vmatprep.subr.mxu1 %v436_v6  ;;  %578 = vmatprep.mubr.f32.mxu1 %v4125_v3  ;;  %v3207_v51 = vld [vmem:[%s4118_s1 + $0x8] sm:$0xff]  ;;  %v451_v5 = vld [vmem:[%s4117_s3 + $0x140] sm:$0xff]  ;;  %v450_v6 = vld [vmem:[%s4117_s3 + $0x138] sm:$0xff] }
 0x110   :  { %629 = vmatpush1.msra.mxu1 %v435_v10  ;;  %826 = vmatprep.mubr.f32.mxu0 %v4125_v3  ;;  %v246_v21 = vpop.f32.mrf.mxu0  ;;  %v3180_v43 = vsel %vm374_vm1, %v389_v38, %v390_v33  ;;  %v452_v4 = vld [vmem:[%s4117_s3 + $0x148] sm:$0xff]  ;;  %v449_v7 = vld [vmem:[%s4117_s3 + $0x130] sm:$0xff]  ;;  %v447_v10 = vld [vmem:[%s4117_s3 + $0x120] sm:$0xff] }
 0x111   :  { %v368_v23 = vmul.f32 %v360_v12, %v334_v18  ;;  %630 = vmatprep.subr.mxu1 %v434_v13  ;;  %579 = vmatmul.mubr.f32.gmra.mxu1 %v3121_v17  ;;  %v3133_v24 = vsel %vm374_vm1, %v376_v61, %v378_v15  ;;  %v3143_v27 = vsel %vm459_vm2, %v461_v62, %v463_v16  ;;  %v392_v42 = vrot.slane %v3121_v17, 1  ;;  %v458_v61 = vld [vmem:[%s4117_s3 + $0x178] sm:$0xff]  ;;  %v457_v62 = vld [vmem:[%s4117_s3 + $0x170] sm:$0xff]  ;;  %v448_v8 = vld [vmem:[%s4117_s3 + $0x128] sm:$0xff] }
 0x112   :  { %631 = vmatpush1.msra.mxu1 %v433_v19  ;;  %827 = vmatmul.mubr.f32.gmra.mxu0 %v3133_v24  ;;  %v336_v31 = vadd.f32 %v335_v22, %v246_v21  ;;  %v446_v11 = vld [vmem:[%s4117_s3 + $0x118] sm:$0xff]  ;;  %v444_v13 = vld [vmem:[%s4117_s3 + $0x108] sm:$0xff]  ;;  %v2094_v18 = vld [vmem:[%s4116_s5 + $0x2f0] sm:$0xff] }
 0x113   :  { %v380_v28 = vrot.slane %v368_v23, 1  ;;  %v465_v29 = vrot.slane %v368_v23, 2  ;;  %632 = vmatprep.subr.mxu1 %v432_v20  ;;  %584 = vmatprep.mubr.f32.mxu1 %v4125_v3  ;;  %v3198_v49 = vsel %vm374_vm1, %v390_v33, %v392_v42  ;;  %v2095_v17 = vld [vmem:[%s4116_s5 + $0x2f8] sm:$0xff]  ;;  %v2093_v20 = vld [vmem:[%s4116_s5 + $0x2e8] sm:$0xff]  ;;  %v2092_v21 = vld [vmem:[%s4116_s5 + $0x2e0] sm:$0xff] }
 0x114   :  { %633 = vmatpush1.msra.mxu1 %v431_v25  ;;  %832 = vmatprep.mubr.f32.mxu0 %v4125_v3  ;;  %v369_v40 = vmul.f32 %v360_v12, %v336_v31  ;;  %4131 = vst [vmem:[#allocation2_spill] sm:$0xff] %v3198_v49  ;;  %v445_v12 = vld [vmem:[%s4117_s3 + $0x110] sm:$0xff]  ;;  %v3303_v19 = vld [vmem:[%s4118_s1 + $0x18] sm:$0xff] }
 0x115   :  { %634 = vmatprep.subr.mxu1 %v430_v26  ;;  %585 = vmatmul.mubr.f32.gmra.mxu1 %v3109_v9  ;;  %v3156_v34 = vsel %vm374_vm1, %v378_v15, %v380_v28  ;;  %v3162_v36 = vsel %vm459_vm2, %v463_v16, %v465_v29  ;;  %v443_v15 = vld [vmem:[%s4117_s3 + $0x100] sm:$0xff]  ;;  %v3317_v22 = vld [vmem:[%s4118_s1 + $0x10] sm:$0xff]  ;;  %v2091_v23 = vld [vmem:[%s4116_s5 + $0x2d8] sm:$0xff] }
 0x116   :  { %635 = vmatpush1.msra.mxu1 %v429_v30  ;;  %833 = vmatmul.mubr.f32.gmra.mxu0 %v3156_v34  ;;  %v394_v47 = vrot.slane %v369_v40, 1  ;;  %v3292_v16 = vld [vmem:[%s4118_s1] sm:$0xff]  ;;  %v2090_v25 = vld [vmem:[%s4116_s5 + $0x2d0] sm:$0xff]  ;;  %v3328_v26 = vld [vmem:[%s4118_s1 + $0x28] sm:$0xff] }
 0x117   :  { %636 = vmatprep.subr.mxu1 %v428_v32  ;;  %590 = vmatprep.mubr.f32.mxu1 %v4125_v3  ;;  %v2089_v28 = vld [vmem:[%s4116_s5 + $0x2c8] sm:$0xff]  ;;  %v2088_v29 = vld [vmem:[%s4116_s5 + $0x2c0] sm:$0xff]  ;;  %v2087_v31 = vld [vmem:[%s4116_s5 + $0x2b8] sm:$0xff] }
 0x118   :  { %637 = vmatpush1.msra.mxu1 %v427_v35  ;;  %838 = vmatprep.mubr.f32.mxu0 %v4125_v3  ;;  %v3218_v54 = vsel %vm374_vm1, %v392_v42, %v394_v47  ;;  %v3342_v30 = vld [vmem:[%s4118_s1 + $0x20] sm:$0xff]  ;;  %v2086_v32 = vld [vmem:[%s4116_s5 + $0x2b0] sm:$0xff]  ;;  %v3353_v33 = vld [vmem:[%s4118_s1 + $0x38] sm:$0xff] }
 0x119   :  { %638 = vmatprep.subr.mxu1 %v426_v37  ;;  %591 = vmatmul.mubr.f32.gmra.mxu1 %v3133_v24  ;;  %4132 = vst [vmem:[#allocation3_spill] sm:$0xff] %v3218_v54  ;;  %v2085_v35 = vld [vmem:[%s4116_s5 + $0x2a8] sm:$0xff]  ;;  %v2084_v37 = vld [vmem:[%s4116_s5 + $0x2a0] sm:$0xff]  ;;  %v3367_v38 = vld [vmem:[%s4118_s1 + $0x30] sm:$0xff] }
 0x11a   :  { %639 = vmatpush1.msra.mxu1 %v425_v39  ;;  %839 = vmatmul.mubr.f32.gmra.mxu0 %v3180_v43  ;;  %v2083_v39 = vld [vmem:[%s4116_s5 + $0x298] sm:$0xff]  ;;  %v2082_v40 = vld [vmem:[%s4116_s5 + $0x290] sm:$0xff]  ;;  %v2081_v42 = vld [vmem:[%s4116_s5 + $0x288] sm:$0xff] }
 0x11b   :  { %640 = vmatprep.subr.mxu1 %v424_v41  ;;  %844 = vmatprep.mubr.f32.mxu0 %v4125_v3  ;;  %v3378_v41 = vld [vmem:[%s4118_s1 + $0x48] sm:$0xff]  ;;  %v2078_v47 = vld [vmem:[%s4116_s5 + $0x270] sm:$0xff] }
 0x11c   :  { %641 = vmatpush1.msra.mxu1 %v423_v44  ;;  %596 = vmatprep.mubr.f32.mxu1 %v4125_v3  ;;  %v2080_v44 = vld [vmem:[%s4116_s5 + $0x280] sm:$0xff] }
 0x11d   :  { %642 = vmatprep.subr.mxu1 %v422_v45  ;;  %597 = vmatmul.mubr.f32.gmra.mxu1 %v3156_v34  ;;  %v3392_v45 = vld [vmem:[%s4118_s1 + $0x40] sm:$0xff] }
 0x11e   :  { %643 = vmatpush1.msra.mxu1 %v421_v46  ;;  %845 = vmatmul.mubr.f32.gmra.mxu0 %v3198_v49  ;;  %v2079_v46 = vld [vmem:[%s4116_s5 + $0x278] sm:$0xff] }
 0x11f   :  { %644 = vmatprep.subr.mxu1 %v420_v48  ;;  %850 = vmatprep.mubr.f32.mxu0 %v4125_v3  ;;  %v3403_v48 = vld [vmem:[%s4118_s1 + $0x58] sm:$0xff] }
 0x120   :  { %645 = vmatpush1.msra.mxu1 %v419_v50  ;;  %2026 = vmatprep.mubr.msk.f32.mxu1 %vm603_vm3, %v3207_v51  ;;  %v2077_v50 = vld [vmem:[%s4116_s5 + $0x268] sm:$0xff] }
 0x121   :  { %646 = vmatprep.subr.mxu1 %v418_v52  ;;  %v2076_v52 = vld [vmem:[%s4116_s5 + $0x260] sm:$0xff] }
 0x122   :  { %647 = vmatpush1.msra.mxu1 %v417_v53  ;;  %851 = vmatmul.mubr.f32.gmra.mxu0 %v3218_v54  ;;  %v3417_v53 = vld [vmem:[%s4118_s1 + $0x50] sm:$0xff] }
 0x123   :  { %648 = vmatprep.subr.mxu1 %v416_v55  ;;  %v2075_v55 = vld [vmem:[%s4116_s5 + $0x258] sm:$0xff]  ;;  %2281 = vmatprep.mubr.msk.f32.mxu0 %vm2529_vm4, %v4125_v3 }
 0x124   :  { %649 = vmatpush1.msra.mxu1 %v415_v56  ;;  %v2074_v56 = vld [vmem:[%s4116_s5 + $0x250] sm:$0xff] }
 0x125   :  { %650 = vmatprep.subr.mxu1 %v414_v57  ;;  %v2073_v57 = vld [vmem:[%s4116_s5 + $0x248] sm:$0xff] }
 0x126   :  { %651 = vmatpush1.msra.mxu1 %v413_v58  ;;  %v2072_v58 = vld [vmem:[%s4116_s5 + $0x240] sm:$0xff] }
 0x127   :  { %652 = vmatprep.subr.mxu1 %v412_v59  ;;  %v2071_v59 = vld [vmem:[%s4116_s5 + $0x238] sm:$0xff] }
 0x128   :  { %653 = vmatpush1.msra.mxu1 %v411_v60  ;;  %v2070_v60 = vld [vmem:[%s4116_s5 + $0x230] sm:$0xff] }
 0x129   :  { %670 = vmatprep.subr.mxu1 %v458_v61  ;;  %v2069_v61 = vld [vmem:[%s4116_s5 + $0x228] sm:$0xff] }
 0x12a   :  { %671 = vmatpush2.msra.mxu1 %v457_v62  ;;  %v2068_v62 = vld [vmem:[%s4116_s5 + $0x220] sm:$0xff] }
 0x12b   :  { %672 = vmatprep.subr.mxu1 %v456_v63  ;;  %v2067_v63 = vld [vmem:[%s4116_s5 + $0x218] sm:$0xff] }
 0x12c   :  { %673 = vmatpush2.msra.mxu1 %v455_v0  ;;  %v2066_v0 = vld [vmem:[%s4116_s5 + $0x210] sm:$0xff] }
 0x12d   :  { %674 = vmatprep.subr.mxu1 %v454_v1  ;;  %v2065_v1 = vld [vmem:[%s4116_s5 + $0x208] sm:$0xff] }
 0x12e   :  { %675 = vmatpush2.msra.mxu1 %v453_v2  ;;  %v2064_v2 = vld [vmem:[%s4116_s5 + $0x200] sm:$0xff] }
 0x12f   :  { %676 = vmatprep.subr.mxu1 %v452_v4  ;;  %v61_v4 = vld [vmem:[%s4119_s8 + $0x78] sm:$0xff] }
 0x130   :  { %677 = vmatpush2.msra.mxu1 %v451_v5  ;;  %2250 = vmatpush3.msra.mxu0 %v61_v4  ;;  %v60_v5 = vld [vmem:[%s4119_s8 + $0x70] sm:$0xff] }
 0x131   :  { %678 = vmatprep.subr.mxu1 %v450_v6  ;;  %2251 = vmatprep.subr.mxu0 %v4125_v3  ;;  %v56_v6 = vld [vmem:[%s4119_s8 + $0x50] sm:$0xff] }
 0x132   :  { %679 = vmatpush2.msra.mxu1 %v449_v7  ;;  %2252 = vmatpush3.msra.mxu0 %v60_v5  ;;  %v55_v7 = vld [vmem:[%s4119_s8 + $0x48] sm:$0xff] }
 0x133   :  { %680 = vmatprep.subr.mxu1 %v448_v8  ;;  %2253 = vmatprep.subr.mxu0 %v4125_v3  ;;  %v54_v8 = vld [vmem:[%s4119_s8 + $0x40] sm:$0xff] }
 0x134   :  { %681 = vmatpush2.msra.mxu1 %v447_v10  ;;  %v53_v10 = vld [vmem:[%s4119_s8 + $0x38] sm:$0xff] }
 0x135   :  { %682 = vmatprep.subr.mxu1 %v446_v11  ;;  %v52_v11 = vld [vmem:[%s4119_s8 + $0x30] sm:$0xff] }
 0x136   :  { %683 = vmatpush2.msra.mxu1 %v445_v12  ;;  %v51_v12 = vld [vmem:[%s4119_s8 + $0x28] sm:$0xff] }
 0x137   :  { %684 = vmatprep.subr.mxu1 %v444_v13  ;;  %v50_v13 = vld [vmem:[%s4119_s8 + $0x20] sm:$0xff] }
 0x138   :  { %685 = vmatpush2.msra.mxu1 %v443_v15  ;;  %v49_v15 = vld [vmem:[%s4119_s8 + $0x18] sm:$0xff] }
 0x139   :  { %687 = vmatmul.mubr.f32.vlgmr.msra.gmra.mxu1 %v3292_v16  ;;  %902 = vmatprep.subr.mxu1 %v2095_v17  ;;  %v48_v17 = vld [vmem:[%s4119_s8 + $0x10] sm:$0xff] }
 0x13a   :  { %903 = vmatpush1.msra.mxu1 %v2094_v18  ;;  %2027 = vmatprep.mubr.msk.f32.mxu1 %vm603_vm3, %v3303_v19  ;;  %v47_v18 = vld [vmem:[%s4119_s8 + $0x8] sm:$0xff] }
 0x13b   :  { %904 = vmatprep.subr.mxu1 %v2093_v20  ;;  %v46_v20 = vld [vmem:[%s4119_s8] sm:$0xff] }
 0x13c   :  { %905 = vmatpush1.msra.mxu1 %v2092_v21 }
 0x13d   :  { %693 = vmatmul.mubr.f32.gmra.mxu1 %v3317_v22  ;;  %906 = vmatprep.subr.mxu1 %v2091_v23 }
 0x13e   :  { %907 = vmatpush1.msra.mxu1 %v2090_v25  ;;  %2028 = vmatprep.mubr.msk.f32.mxu1 %vm603_vm3, %v3328_v26 }
 0x13f   :  { %908 = vmatprep.subr.mxu1 %v2089_v28 }
 0x140   :  { %909 = vmatpush1.msra.mxu1 %v2088_v29 }
 0x141   :  { %699 = vmatmul.mubr.f32.gmra.mxu1 %v3342_v30  ;;  %910 = vmatprep.subr.mxu1 %v2087_v31 }
 0x142   :  { %911 = vmatpush1.msra.mxu1 %v2086_v32  ;;  %2029 = vmatprep.mubr.msk.f32.mxu1 %vm603_vm3, %v3353_v33 }
 0x143   :  { %912 = vmatprep.subr.mxu1 %v2085_v35 }
 0x144   :  { %913 = vmatpush1.msra.mxu1 %v2084_v37 }
 0x145   :  { %705 = vmatmul.mubr.f32.gmra.mxu1 %v3367_v38  ;;  %914 = vmatprep.subr.mxu1 %v2083_v39 }
 0x146   :  { %915 = vmatpush1.msra.mxu1 %v2082_v40  ;;  %2030 = vmatprep.mubr.msk.f32.mxu1 %vm603_vm3, %v3378_v41 }
 0x147   :  { %916 = vmatprep.subr.mxu1 %v2081_v42 }
 0x148   :  { %917 = vmatpush1.msra.mxu1 %v2080_v44 }
 0x149   :  { %711 = vmatmul.mubr.f32.gmra.mxu1 %v3392_v45  ;;  %918 = vmatprep.subr.mxu1 %v2079_v46 }
 0x14a   :  { %919 = vmatpush1.msra.mxu1 %v2078_v47  ;;  %2031 = vmatprep.mubr.msk.f32.mxu1 %vm603_vm3, %v3403_v48 }
 0x14b   :  { %920 = vmatprep.subr.mxu1 %v2077_v50 }
 0x14c   :  { %921 = vmatpush1.msra.mxu1 %v2076_v52 }
 0x14d   :  { %717 = vmatmul.mubr.f32.gmra.mxu1 %v3417_v53  ;;  %922 = vmatprep.subr.mxu1 %v2075_v55 }
 0x14e   :  { %923 = vmatpush1.msra.mxu1 %v2074_v56  ;;  %966 = vmatprep.mubr.f32.mxu1 %v4125_v3 }
 0x14f   :  { %924 = vmatprep.subr.mxu1 %v2073_v57 }
 0x150   :  { %925 = vmatpush1.msra.mxu1 %v2072_v58 }
 0x151   :  { %926 = vmatprep.subr.mxu1 %v2071_v59 }
 0x152   :  { %927 = vmatpush1.msra.mxu1 %v2070_v60 }
 0x153   :  { %928 = vmatprep.subr.mxu1 %v2069_v61 }
 0x154   :  { %929 = vmatpush1.msra.mxu1 %v2068_v62 }
 0x155   :  { %930 = vmatprep.subr.mxu1 %v2067_v63 }
 0x156   :  { %931 = vmatpush1.msra.mxu1 %v2066_v0 }
 0x157   :  { %932 = vmatprep.subr.mxu1 %v2065_v1 }
 0x158   :  { %933 = vmatpush1.msra.mxu1 %v2064_v2 }
 0x159   :  { %967 = vmatmul.mubr.f32.vlgmr.msra.gmra.mxu1 %v3180_v43 }
 0x15a   :  { %972 = vmatprep.mubr.f32.mxu1 %v4125_v3 }
 0x15d   :  { %973 = vmatmul.mubr.f32.gmra.mxu1 %v3198_v49  ;;  %v3540_v49 = vpop.permute.xlu1 %1022 }
 0x15e   :  { %978 = vmatprep.mubr.f32.mxu1 %v4125_v3 }
 0x161   :  { %979 = vmatmul.mubr.f32.gmra.mxu1 %v3218_v54 }
 0x162   :  { %984 = vmatprep.mubr.f32.mxu1 %v4125_v3 }
 0x165   :  { %985 = vmatmul.mubr.f32.gmra.mxu1 %v3119_v14  ;;  %v59_v14 = vld [vmem:[%s4119_s8 + $0x68] sm:$0xff] }
 0x166   :  { %990 = vmatprep.mubr.f32.mxu1 %v4125_v3  ;;  %2254 = vmatpush3.msra.mxu0 %v59_v14 }
 0x167   :  { %2255 = vmatprep.subr.mxu0 %v4125_v3 }
 0x169   :  { %991 = vmatmul.mubr.f32.gmra.mxu1 %v3143_v27  ;;  %v58_v27 = vld [vmem:[%s4119_s8 + $0x60] sm:$0xff] }
 0x16a   :  { %996 = vmatprep.mubr.f32.mxu1 %v4125_v3  ;;  %2256 = vmatpush3.msra.mxu0 %v58_v27 }
 0x16b   :  { %2257 = vmatprep.subr.mxu0 %v4125_v3 }
 0x16d   :  { %997 = vmatmul.mubr.f32.gmra.mxu1 %v3162_v36  ;;  %v57_v36 = vld [vmem:[%s4119_s8 + $0x58] sm:$0xff] }
 0x16e   :  { %2258 = vmatpush3.msra.mxu0 %v57_v36 }
 0x16f   :  { %2259 = vmatprep.subr.mxu0 %v4125_v3 }
 0x170   :  { %2260 = vmatpush3.msra.mxu0 %v56_v6 }
 0x171   :  { %2261 = vmatprep.subr.mxu0 %v4125_v3 }
 0x172   :  { %2262 = vmatpush3.msra.mxu0 %v55_v7 }
 0x173   :  { %2263 = vmatprep.subr.mxu0 %v4125_v3 }
 0x174   :  { %2264 = vmatpush3.msra.mxu0 %v54_v8 }
 0x175   :  { %2265 = vmatprep.subr.mxu0 %v4125_v3 }
 0x176   :  { %2266 = vmatpush3.msra.mxu0 %v53_v10 }
 0x177   :  { %2267 = vmatprep.subr.mxu0 %v4125_v3 }
 0x178   :  { %2268 = vmatpush3.msra.mxu0 %v52_v11 }
 0x179   :  { %2269 = vmatprep.subr.mxu0 %v4125_v3 }
 0x17a   :  { %2270 = vmatpush3.msra.mxu0 %v51_v12 }
 0x17b   :  { %2271 = vmatprep.subr.mxu0 %v4125_v3 }
 0x17c   :  { %2272 = vmatpush3.msra.mxu0 %v50_v13 }
 0x17d   :  { %2273 = vmatprep.subr.mxu0 %v4125_v3 }
 0x17e   :  { %2274 = vmatpush3.msra.mxu0 %v49_v15  ;;  %v3536_v15 = vpop.permute.xlu0 %1017 }
 0x17f   :  { %2275 = vmatprep.subr.mxu0 %v4125_v3 }
 0x180   :  { %2276 = vmatpush3.msra.mxu0 %v48_v17 }
 0x181   :  { %2277 = vmatprep.subr.mxu0 %v4125_v3 }
 0x182   :  { %2278 = vmatpush3.msra.mxu0 %v47_v18 }
 0x183   :  { %2279 = vmatprep.subr.mxu0 %v4125_v3 }
 0x184   :  { %2280 = vmatpush3.msra.mxu0 %v46_v20 }
 0x185   :  { %1497 = vmatprep.subr.mxu0 %v4125_v3 }
 0x1c9   :  { %v568_v21 = vpop.f32.mrf.mxu1 }
 0x1cb   :  { %v570_v23 = vpop.f32.mrf.mxu1 }
 0x1cd   :  { %v574_v25 = vpop.f32.mrf.mxu1 }
 0x1ce   :  { %v822_v52 = vpop.f32.mrf.mxu0 }
 0x1cf   :  { %v576_v28 = vpop.f32.mrf.mxu1 }
 0x1d0   :  { %v824_v57 = vpop.f32.mrf.mxu0 }
 0x1d1   :  { %v580_v29 = vpop.f32.mrf.mxu1 }
 0x1d2   :  { %v828_v60 = vpop.f32.mrf.mxu0 }
 0x1d3   :  { %v582_v31 = vpop.f32.mrf.mxu1 }
 0x1d4   :  { %v830_v62 = vpop.f32.mrf.mxu0 }
 0x1d5   :  { %v586_v32 = vpop.f32.mrf.mxu1 }
 0x1d6   :  { %v834_v0 = vpop.f32.mrf.mxu0 }
 0x1d7   :  { %v588_v35 = vpop.f32.mrf.mxu1 }
 0x1d8   :  { %v836_v2 = vpop.f32.mrf.mxu0 }
 0x1d9   :  { %v592_v37 = vpop.f32.mrf.mxu1 }
 0x1da   :  { %v840_v5 = vpop.f32.mrf.mxu0 }
 0x1db   :  { %v594_v39 = vpop.f32.mrf.mxu1 }
 0x1dc   :  { %v842_v10 = vpop.f32.mrf.mxu0 }
 0x1dd   :  { %v598_v40 = vpop.f32.mrf.mxu1 }
 0x1df   :  { %v3534_v42 = vpop.f32.mrf.mxu1 }
 0x1f9   :  { %v688_v44 = vpop.f32.mrf.mxu1 }
 0x1fa   :  { %v689_v36 = vadd.f32 %v688_v44, %v568_v21  ;;  %v846_v21 = vpop.f32.mrf.mxu0 }
 0x1fb   :  { %v690_v46 = vpop.f32.mrf.mxu1 }
 0x1fc   :  { %v691_v11 = vadd.f32 %v690_v46, %v570_v23  ;;  %v857_v18 = vadd.f32 %v822_v52, %v689_v36 }
 0x1fd   :  { %v694_v47 = vpop.f32.mrf.mxu1 }
 0x1fe   :  { %v695_v14 = vadd.f32 %v694_v47, %v574_v25 }
 0x1ff   :  { %v696_v50 = vpop.f32.mrf.mxu1 }
 0x200   :  { %v697_v6 = vadd.f32 %v696_v50, %v576_v28  ;;  %v859_v12 = vadd.f32 %v828_v60, %v695_v14  ;;  %v3552_v60 = vpop.permute.xlu0 %1027 }
 0x201   :  { %v700_v55 = vpop.f32.mrf.mxu1 }
 0x202   :  { %v701_v8 = vadd.f32 %v700_v55, %v580_v29  ;;  %v860_v3 = vadd.f32 %v830_v62, %v697_v6  ;;  %v858_v29 = vadd.f32 %v824_v57, %v691_v11 }
 0x203   :  { %v702_v56 = vpop.f32.mrf.mxu1 }
 0x204   :  { %v703_v17 = vadd.f32 %v702_v56, %v582_v31  ;;  %v861_v47 = vadd.f32 %v834_v0, %v701_v8  ;;  %v848_v0 = vpop.f32.mrf.mxu0 }
 0x205   :  { %v706_v58 = vpop.f32.mrf.mxu1 }
 0x206   :  { %v707_v25 = vadd.f32 %v706_v58, %v586_v32  ;;  %v862_v55 = vadd.f32 %v836_v2, %v703_v17  ;;  %v3562_v2 = vpop.permute.xlu1 %1032  ;;  %v3579_v17 = vpop.permute.xlu0 %1037 }
 0x207   :  { %v708_v59 = vpop.f32.mrf.mxu1 }
 0x208   :  { %v709_v46 = vadd.f32 %v708_v59, %v588_v35  ;;  %v863_v62 = vadd.f32 %v840_v5, %v707_v25 }
 0x209   :  { %v712_v61 = vpop.f32.mrf.mxu1 }
 0x20a   :  { %v713_v32 = vadd.f32 %v712_v61, %v592_v37  ;;  %v864_v37 = vadd.f32 %v842_v10, %v709_v46 }
 0x20b   :  { %v714_v63 = vpop.f32.mrf.mxu1 }
 0x20c   :  { %v715_v58 = vadd.f32 %v714_v63, %v594_v39  ;;  %v852_v39 = vpop.f32.mrf.mxu0 }
 0x20d   :  { %v718_v1 = vpop.f32.mrf.mxu1 }
 0x20e   :  { %v719_v14 = vadd.f32 %v718_v1, %v598_v40  ;;  %v865_v40 = vadd.f32 %v846_v21, %v713_v32 }
 0x20f   :  { %v720_v4 = vpop.f32.mrf.mxu1 }
 0x210   :  { %v721_v6 = vadd.f32 %v720_v4, %v3534_v42  ;;  %v867_v25 = vadd.f32 %v852_v39, %v719_v14 }
 0x219   :  { %v968_v27 = vpop.f32.mrf.mxu1 }
 0x21a   :  { %v3542_v28 = vadd.f32 %v968_v27, %v857_v18 }
 0x21b   :  { %v970_v7 = vpop.f32.mrf.mxu1 }
 0x21c   :  { %v3548_v31 = vadd.f32 %v970_v7, %v858_v29 }
 0x21d   :  { %v974_v13 = vpop.f32.mrf.mxu1 }
 0x21e   :  { %v3538_v20 = vadd.f32 %v974_v13, %v859_v12  ;;  %v1046_v61 = vmul.f32 %v3536_v15, %v3548_v31  ;;  %v866_v13 = vadd.f32 %v848_v0, %v715_v58 }
 0x21f   :  { %v976_v54 = vpop.f32.mrf.mxu1 }
 0x220   :  { %v3544_v44 = vadd.f32 %v976_v54, %v860_v3  ;;  %v1047_v52 = vmul.f32 %v3540_v49, %v3538_v20  ;;  %v1045_v3 = vmul.f32 %v3536_v15, %v3542_v28  ;;  %v1080_v21 = vmul.f32 %v1046_v61, %v3548_v31 }
 0x221   :  { %v980_v23 = vpop.f32.mrf.mxu1 }
 0x222   :  { %v3546_v50 = vadd.f32 %v980_v23, %v861_v47  ;;  %v1048_v54 = vmul.f32 %v3540_v49, %v3544_v44  ;;  %v1081_v63 = vmul.f32 %v1047_v52, %v3538_v20  ;;  %v1079_v1 = vmul.f32 %v1045_v3, %v3542_v28  ;;  %v854_v47 = vpop.f32.mrf.mxu0 }
 0x223   :  { %v982_v56 = vpop.f32.mrf.mxu1  ;;  %v1057_v18 = vadd.f32 %v1047_v52, %v1045_v3  ;;  %v868_v58 = vadd.f32 %v854_v47, %v721_v6 }
 0x224   :  { %v1049_v35 = vmul.f32 %v3552_v60, %v3546_v50  ;;  %v3560_v57 = vadd.f32 %v982_v56, %v862_v55  ;;  %v1082_v10 = vmul.f32 %v1048_v54, %v3544_v44  ;;  %v1091_v29 = vadd.f32 %v1081_v63, %v1079_v1 }
 0x225   :  { %v986_v59 = vpop.f32.mrf.mxu1  ;;  %v1068_v56 = vadd.f32 %v1048_v54, %v1046_v61 }
 0x226   :  { %v3564_v27 = vadd.f32 %v986_v59, %v863_v62  ;;  %v1050_v5 = vmul.f32 %v3552_v60, %v3560_v57  ;;  %v1083_v11 = vmul.f32 %v1049_v35, %v3546_v50  ;;  %v1058_v32 = vadd.f32 %v1057_v18, %v1049_v35 }
 0x227   :  { %v988_v36 = vpop.f32.mrf.mxu1  ;;  %v1102_v62 = vadd.f32 %v1082_v10, %v1080_v21 }
 0x228   :  { %v1051_v7 = vmul.f32 %v3562_v2, %v3564_v27  ;;  %v3574_v8 = vadd.f32 %v988_v36, %v864_v37  ;;  %v1084_v23 = vmul.f32 %v1050_v5, %v3560_v57  ;;  %v1092_v0 = vadd.f32 %v1091_v29, %v1083_v11 }
 0x229   :  { %v992_v12 = vpop.f32.mrf.mxu1  ;;  %v1069_v37 = vadd.f32 %v1068_v56, %v1050_v5 }
 0x22a   :  { %v1052_v42 = vmul.f32 %v3562_v2, %v3574_v8  ;;  %v3583_v4 = vadd.f32 %v992_v12, %v865_v40  ;;  %v1085_v46 = vmul.f32 %v1051_v7, %v3564_v27  ;;  %v1059_v39 = vadd.f32 %v1058_v32, %v1051_v7  ;;  %v3596_v40 = vpop.permute.xlu1 %1042 }
 0x22b   :  { %v994_v55 = vpop.f32.mrf.mxu1  ;;  %v1103_v54 = vadd.f32 %v1102_v62, %v1084_v23 }
 0x22c   :  { %v1053_v52 = vmul.f32 %v3579_v17, %v3583_v4  ;;  %v1086_v3 = vmul.f32 %v1052_v42, %v3574_v8  ;;  %v3591_v59 = vadd.f32 %v994_v55, %v866_v13  ;;  %v1093_v35 = vadd.f32 %v1092_v0, %v1085_v46 }
 0x22d   :  { %v998_v14 = vpop.f32.mrf.mxu1  ;;  %v1070_v1 = vadd.f32 %v1069_v37, %v1052_v42 }
 0x22e   :  { %v1087_v63 = vmul.f32 %v1053_v52, %v3583_v4  ;;  %v3594_v36 = vadd.f32 %v998_v14, %v867_v25  ;;  %v1054_v61 = vmul.f32 %v3579_v17, %v3591_v59  ;;  %v1060_v10 = vadd.f32 %v1059_v39, %v1053_v52 }
 0x22f   :  { %v1000_v6 = vpop.f32.mrf.mxu1  ;;  %v1104_v5 = vadd.f32 %v1103_v54, %v1086_v3 }
 0x230   :  { %v1055_v11 = vmul.f32 %v3596_v40, %v3594_v36  ;;  %v3602_v12 = vadd.f32 %v1000_v6, %v868_v58  ;;  %v1094_v7 = vadd.f32 %v1093_v35, %v1087_v63  ;;  %v1088_v13 = vmul.f32 %v1054_v61, %v3591_v59 }
 0x231   :  { %v1071_v18 = vadd.f32 %v1070_v1, %v1054_v61 }
 0x232   :  { %v1061_v25 = vadd.f32 %v1060_v10, %v1055_v11  ;;  %v1089_v47 = vmul.f32 %v1055_v11, %v3594_v36  ;;  %v1056_v21 = vmul.f32 %v3596_v40, %v3602_v12  ;;  %v1105_v29 = vadd.f32 %v1104_v5, %v1088_v13 }
 0x234   :  { %v1062_v23 = vrot.slane %v1061_v25, 4  ;;  %v1095_v42 = vadd.f32 %v1094_v7, %v1089_v47  ;;  %v1072_v46 = vadd.f32 %v1071_v18, %v1056_v21  ;;  %v1090_v55 = vmul.f32 %v1056_v21, %v3602_v12 }
 0x236   :  { %v1063_v56 = vadd.f32 %v1062_v23, %v1061_v25  ;;  %v1096_v32 = vrot.slane %v1095_v42, 4  ;;  %v1073_v52 = vrot.slane %v1072_v46, 4  ;;  %v1106_v58 = vadd.f32 %v1105_v29, %v1090_v55  ;;  %v1377_v23 = vld [vmem:[%s4120_s4 + $0x78] sm:$0xff] }
 0x237   :  { %v4133_v55 = vmov 0.0  }
 0x238   :  { %v1064_v62 = vrot.slane %v1063_v56, 2  ;;  %v1097_v0 = vadd.f32 %v1096_v32, %v1095_v42  ;;  %v1074_v3 = vadd.f32 %v1073_v52, %v1072_v46  ;;  %v1107_v14 = vrot.slane %v1106_v58, 4  ;;  %v1376_v46 = vld [vmem:[%s4120_s4 + $0x70] sm:$0xff]  ;;  %v1374_v32 = vld [vmem:[%s4120_s4 + $0x60] sm:$0xff] }
 0x239   :  { %v1372_v52 = vld [vmem:[%s4120_s4 + $0x50] sm:$0xff] }
 0x23a   :  { %v1065_v37 = vadd.f32 %v1064_v62, %v1063_v56  ;;  %v1098_v39 = vrot.slane %v1097_v0, 2  ;;  %v1075_v63 = vrot.slane %v1074_v3, 2  ;;  %v1108_v54 = vadd.f32 %v1107_v14, %v1106_v58  ;;  %v1375_v56 = vld [vmem:[%s4120_s4 + $0x68] sm:$0xff]  ;;  %v1370_v62 = vld [vmem:[%s4120_s4 + $0x40] sm:$0xff] }
 0x23b   :  { %v1371_v58 = vld [vmem:[%s4120_s4 + $0x48] sm:$0xff] }
 0x23c   :  { %v1066_v35 = vrot.slane %v1065_v37, 1  ;;  %v1099_v61 = vadd.f32 %v1098_v39, %v1097_v0  ;;  %v1076_v6 = vadd.f32 %v1075_v63, %v1074_v3  ;;  %v1109_v1 = vrot.slane %v1108_v54, 2  ;;  %v1369_v0 = vld [vmem:[%s4120_s4 + $0x38] sm:$0xff]  ;;  %v1368_v3 = vld [vmem:[%s4120_s4 + $0x30] sm:$0xff]  ;;  %v1367_v14 = vld [vmem:[%s4120_s4 + $0x28] sm:$0xff] }
 0x23d   :  { %v1365_v39 = vld [vmem:[%s4120_s4 + $0x18] sm:$0xff]  ;;  %v1364_v63 = vld [vmem:[%s4120_s4 + $0x10] sm:$0xff] }
 0x23e   :  { %v1100_v10 = vrot.slane %v1099_v61, 1  ;;  %v1077_v11 = vrot.slane %v1076_v6, 1  ;;  %v1110_v5 = vadd.f32 %v1109_v1, %v1108_v54  ;;  %v1067_v7 = vadd.f32 %v1066_v35, %v1065_v37  ;;  %v1366_v37 = vld [vmem:[%s4120_s4 + $0x20] sm:$0xff]  ;;  %v1363_v54 = vld [vmem:[%s4120_s4 + $0x8] sm:$0xff] }
 0x23f   :  { %v1362_v35 = vld [vmem:[%s4120_s4] sm:$0xff]  ;;  %v1383_v1 = vld [vmem:[%s4120_s4 + $0xa8] sm:$0xff] }
 0x240   :  { %v1078_v13 = vadd.f32 %v1077_v11, %v1076_v6  ;;  %v1101_v18 = vadd.f32 %v1100_v10, %v1099_v61  ;;  %v1111_v25 = vrot.slane %v1110_v5, 1  ;;  %v1385_v61 = vld [vmem:[%s4120_s4 + $0xb8] sm:$0xff]  ;;  %v1384_v6 = vld [vmem:[%s4120_s4 + $0xb0] sm:$0xff]  ;;  %v1382_v10 = vld [vmem:[%s4120_s4 + $0xa0] sm:$0xff] }
 0x241   :  { %v1381_v11 = vld [vmem:[%s4120_s4 + $0x98] sm:$0xff] }
 0x242   :  { %v1112_v47 = vadd.f32 %v1111_v25, %v1110_v5  ;;  %v1114_v21 = vsel %vm1113_vm5, %v1067_v7, %v1078_v13  ;;  %v1380_v5 = vld [vmem:[%s4120_s4 + $0x90] sm:$0xff]  ;;  %v1379_v7 = vld [vmem:[%s4120_s4 + $0x88] sm:$0xff]  ;;  %v1378_v13 = vld [vmem:[%s4120_s4 + $0x80] sm:$0xff] }
 0x243   :  { %v1116_v29 = vsel %vm1115_vm6, %v1114_v21, %v1101_v18  ;;  %v2147_v18 = vld [vmem:[%s4121_s6 + $0x178] sm:$0xff]  ;;  %v1400_v21 = vld [vmem:[%s4121_s6 + $0x70] sm:$0xff] }
 0x244   :  { %v1118_v42 = vsel %vm1117_vm7, %v1116_v29, %v1112_v47  ;;  %v1401_v25 = vld [vmem:[%s4121_s6 + $0x78] sm:$0xff]  ;;  %v2146_v47 = vld [vmem:[%s4121_s6 + $0x170] sm:$0xff]  ;;  %v2145_v29 = vld [vmem:[%s4121_s6 + $0x168] sm:$0xff] }
 0x245   :  { %2282 = vmatmul.mubr.f32.vlgmr.msra.gmra.mxu0 %v1118_v42  ;;  %2284 = vmatprep.subr.mxu1 %v1401_v25  ;;  %v1398_v42 = vld [vmem:[%s4121_s6 + $0x60] sm:$0xff] }
 0x246   :  { %1498 = vmatpush1.msra.mxu0 %v1377_v23  ;;  %2110 = vmatprep.mubr.msk.f32.mxu0 %vm603_vm3, %v3207_v51  ;;  %v1373_v51 = vld [vmem:[%s4120_s4 + $0x58] sm:$0xff]  ;;  %v2144_v23 = vld [vmem:[%s4121_s6 + $0x160] sm:$0xff] }
 0x247   :  { %1499 = vmatprep.subr.mxu0 %v4133_v55  ;;  %2285 = vmatpush3.msra.mxu1 %v1401_v25 }
 0x248   :  { %1500 = vmatpush1.msra.mxu0 %v1376_v46  ;;  %2286 = vmatprep.subr.mxu1 %v1400_v21  ;;  %v2143_v46 = vld [vmem:[%s4121_s6 + $0x158] sm:$0xff] }
 0x249   :  { %1501 = vmatprep.subr.mxu0 %v4133_v55  ;;  %2287 = vmatpush3.msra.mxu1 %v1400_v21 }
 0x24a   :  { %1502 = vmatpush1.msra.mxu0 %v1375_v56  ;;  %v1397_v56 = vld [vmem:[%s4121_s6 + $0x58] sm:$0xff] }
 0x24b   :  { %1503 = vmatprep.subr.mxu0 %v4133_v55 }
 0x24c   :  { %1504 = vmatpush1.msra.mxu0 %v1374_v32  ;;  %v2142_v32 = vld [vmem:[%s4121_s6 + $0x150] sm:$0xff] }
 0x24d   :  { %1505 = vmatprep.subr.mxu0 %v4133_v55 }
 0x24e   :  { %1506 = vmatpush1.msra.mxu0 %v1373_v51  ;;  %v1396_v51 = vld [vmem:[%s4121_s6 + $0x50] sm:$0xff] }
 0x24f   :  { %1507 = vmatprep.subr.mxu0 %v4133_v55 }
 0x250   :  { %1508 = vmatpush1.msra.mxu0 %v1372_v52  ;;  %v2141_v52 = vld [vmem:[%s4121_s6 + $0x148] sm:$0xff] }
 0x251   :  { %1509 = vmatprep.subr.mxu0 %v4133_v55 }
 0x252   :  { %1510 = vmatpush1.msra.mxu0 %v1371_v58  ;;  %v1395_v58 = vld [vmem:[%s4121_s6 + $0x48] sm:$0xff] }
 0x253   :  { %1511 = vmatprep.subr.mxu0 %v4133_v55 }
 0x254   :  { %1512 = vmatpush1.msra.mxu0 %v1370_v62  ;;  %v2140_v62 = vld [vmem:[%s4121_s6 + $0x140] sm:$0xff] }
 0x255   :  { %1513 = vmatprep.subr.mxu0 %v4133_v55 }
 0x256   :  { %1514 = vmatpush1.msra.mxu0 %v1369_v0  ;;  %v2139_v0 = vld [vmem:[%s4121_s6 + $0x138] sm:$0xff] }
 0x257   :  { %1515 = vmatprep.subr.mxu0 %v4133_v55 }
 0x258   :  { %1516 = vmatpush1.msra.mxu0 %v1368_v3  ;;  %v2138_v3 = vld [vmem:[%s4121_s6 + $0x130] sm:$0xff] }
 0x259   :  { %1517 = vmatprep.subr.mxu0 %v4133_v55 }
 0x25a   :  { %1518 = vmatpush1.msra.mxu0 %v1367_v14  ;;  %v1392_v14 = vld [vmem:[%s4121_s6 + $0x30] sm:$0xff] }
 0x25b   :  { %1519 = vmatprep.subr.mxu0 %v4133_v55 }
 0x25c   :  { %1520 = vmatpush1.msra.mxu0 %v1366_v37  ;;  %v2136_v37 = vld [vmem:[%s4121_s6 + $0x120] sm:$0xff] }
 0x25d   :  { %1521 = vmatprep.subr.mxu0 %v4133_v55 }
 0x25e   :  { %1522 = vmatpush1.msra.mxu0 %v1365_v39  ;;  %v1390_v39 = vld [vmem:[%s4121_s6 + $0x20] sm:$0xff] }
 0x25f   :  { %1523 = vmatprep.subr.mxu0 %v4133_v55 }
 0x260   :  { %1524 = vmatpush1.msra.mxu0 %v1364_v63  ;;  %v2134_v63 = vld [vmem:[%s4121_s6 + $0x110] sm:$0xff] }
 0x261   :  { %1525 = vmatprep.subr.mxu0 %v4133_v55 }
 0x262   :  { %1526 = vmatpush1.msra.mxu0 %v1363_v54  ;;  %v1388_v54 = vld [vmem:[%s4121_s6 + $0x10] sm:$0xff] }
 0x263   :  { %1527 = vmatprep.subr.mxu0 %v4133_v55 }
 0x264   :  { %1528 = vmatpush1.msra.mxu0 %v1362_v35  ;;  %v2132_v35 = vld [vmem:[%s4121_s6 + $0x100] sm:$0xff] }
 0x265   :  { %1545 = vmatprep.subr.mxu0 %v4133_v55 }
 0x266   :  { %1546 = vmatpush2.msra.mxu0 %v1385_v61  ;;  %v1386_v61 = vld [vmem:[%s4121_s6] sm:$0xff] }
 0x267   :  { %1547 = vmatprep.subr.mxu0 %v4133_v55 }
 0x268   :  { %1548 = vmatpush2.msra.mxu0 %v1384_v6 }
 0x269   :  { %1549 = vmatprep.subr.mxu0 %v4133_v55 }
 0x26a   :  { %1550 = vmatpush2.msra.mxu0 %v1383_v1 }
 0x26b   :  { %1551 = vmatprep.subr.mxu0 %v4133_v55 }
 0x26c   :  { %1552 = vmatpush2.msra.mxu0 %v1382_v10 }
 0x26d   :  { %1553 = vmatprep.subr.mxu0 %v4133_v55 }
 0x26e   :  { %1554 = vmatpush2.msra.mxu0 %v1381_v11 }
 0x26f   :  { %1555 = vmatprep.subr.mxu0 %v4133_v55 }
 0x270   :  { %1556 = vmatpush2.msra.mxu0 %v1380_v5 }
 0x271   :  { %1557 = vmatprep.subr.mxu0 %v4133_v55 }
 0x272   :  { %1558 = vmatpush2.msra.mxu0 %v1379_v7 }
 0x273   :  { %1559 = vmatprep.subr.mxu0 %v4133_v55 }
 0x274   :  { %1560 = vmatpush2.msra.mxu0 %v1378_v13  ;;  %v3828_v13 = vld [vmem:[%s4122_s7] sm:$0x3f] }
 0x275   :  { %2366 = vmatprep.subr.mxu0 %v2147_v18  ;;  %1562 = vmatmul.mubr.f32.vlgmr.msra.gmra.mxu0 %v3292_v16  ;;  %v1399_v16 = vld [vmem:[%s4121_s6 + $0x68] sm:$0xff]  ;;  %v1198_v25 = vrot.slane %v3828_v13, 6 }
 0x276   :  { %2367 = vmatpush3.msra.mxu0 %v2147_v18  ;;  %2288 = vmatprep.subr.mxu1 %v1399_v16  ;;  %v1209_v18 = vlaneseq }
 0x277   :  { %2368 = vmatprep.subr.mxu0 %v2146_v47  ;;  %2289 = vmatpush3.msra.mxu1 %v1399_v16 }
 0x278   :  { %2369 = vmatpush3.msra.mxu0 %v2146_v47  ;;  %2290 = vmatprep.subr.mxu1 %v1398_v42  ;;  %v1265_v47 = vrot.slane %v3828_v13, 7  ;;  %v3832_v21 = vshrl.u32 %v1209_v18, 7 }
 0x279   :  { %2370 = vmatprep.subr.mxu0 %v2145_v29  ;;  %2291 = vmatpush3.msra.mxu1 %v1398_v42 }
 0x27a   :  { %2371 = vmatpush3.msra.mxu0 %v2145_v29  ;;  %2292 = vmatprep.subr.mxu1 %v1397_v56  ;;  %v1211_v42 = vsub.s32 2, %v3832_v21 }
 0x27b   :  { %2372 = vmatprep.subr.mxu0 %v2144_v23  ;;  %2293 = vmatpush3.msra.mxu1 %v1397_v56 }
 0x27c   :  { %2373 = vmatpush3.msra.mxu0 %v2144_v23  ;;  %2294 = vmatprep.subr.mxu1 %v1396_v51 }
 0x27d   :  { %2374 = vmatprep.subr.mxu0 %v2143_v46  ;;  %2111 = vmatprep.mubr.msk.f32.mxu0 %vm603_vm3, %v3303_v19  ;;  %v1394_v19 = vld [vmem:[%s4121_s6 + $0x40] sm:$0xff] }
 0x27e   :  { %2375 = vmatpush3.msra.mxu0 %v2143_v46  ;;  %2295 = vmatpush3.msra.mxu1 %v1396_v51 }
 0x27f   :  { %2376 = vmatprep.subr.mxu0 %v2142_v32  ;;  %1567 = vmatmul.mubr.f32.gmra.mxu0 %v3317_v22  ;;  %v1393_v22 = vld [vmem:[%s4121_s6 + $0x38] sm:$0xff] }
 0x280   :  { %2377 = vmatpush3.msra.mxu0 %v2142_v32  ;;  %2296 = vmatprep.subr.mxu1 %v1395_v58  ;;  %v1278_v32 = vsub.s32 3, %v3832_v21 }
 0x281   :  { %2378 = vmatprep.subr.mxu0 %v2141_v52  ;;  %2297 = vmatpush3.msra.mxu1 %v1395_v58 }
 0x282   :  { %2379 = vmatpush3.msra.mxu0 %v2141_v52  ;;  %2298 = vmatprep.subr.mxu1 %v1394_v19 }
 0x283   :  { %2380 = vmatprep.subr.mxu0 %v2140_v62  ;;  %2112 = vmatprep.mubr.msk.f32.mxu0 %vm603_vm3, %v3328_v26  ;;  %v2137_v26 = vld [vmem:[%s4121_s6 + $0x128] sm:$0xff] }
 0x284   :  { %2381 = vmatpush3.msra.mxu0 %v2140_v62  ;;  %2299 = vmatpush3.msra.mxu1 %v1394_v19  ;;  %v1221_v19 = vsub.s32 1, %v3832_v21 }
 0x285   :  { %1572 = vmatmul.mubr.f32.gmra.mxu0 %v3342_v30  ;;  %2382 = vmatprep.subr.mxu0 %v2139_v0  ;;  %v1391_v30 = vld [vmem:[%s4121_s6 + $0x28] sm:$0xff] }
 0x286   :  { %2300 = vmatprep.subr.mxu1 %v1393_v22  ;;  %2383 = vmatpush3.msra.mxu0 %v2139_v0 }
 0x287   :  { %2301 = vmatpush3.msra.mxu1 %v1393_v22  ;;  %2384 = vmatprep.subr.mxu0 %v2138_v3 }
 0x288   :  { %2302 = vmatprep.subr.mxu1 %v1392_v14  ;;  %2113 = vmatprep.mubr.msk.f32.mxu0 %vm603_vm3, %v3353_v33  ;;  %v2135_v33 = vld [vmem:[%s4121_s6 + $0x118] sm:$0xff] }
 0x289   :  { %2385 = vmatpush3.msra.mxu0 %v2138_v3  ;;  %2303 = vmatpush3.msra.mxu1 %v1392_v14 }
 0x28a   :  { %1577 = vmatmul.mubr.f32.gmra.mxu0 %v3367_v38  ;;  %2386 = vmatprep.subr.mxu0 %v2137_v26  ;;  %v1389_v38 = vld [vmem:[%s4121_s6 + $0x18] sm:$0xff] }
 0x28b   :  { %2304 = vmatprep.subr.mxu1 %v1391_v30  ;;  %2387 = vmatpush3.msra.mxu0 %v2137_v26 }
 0x28c   :  { %2305 = vmatpush3.msra.mxu1 %v1391_v30  ;;  %2388 = vmatprep.subr.mxu0 %v2136_v37 }
 0x28d   :  { %2306 = vmatprep.subr.mxu1 %v1390_v39  ;;  %2114 = vmatprep.mubr.msk.f32.mxu0 %vm603_vm3, %v3378_v41  ;;  %v2133_v41 = vld [vmem:[%s4121_s6 + $0x108] sm:$0xff] }
 0x28e   :  { %2389 = vmatpush3.msra.mxu0 %v2136_v37  ;;  %2307 = vmatpush3.msra.mxu1 %v1390_v39 }
 0x28f   :  { %1582 = vmatmul.mubr.f32.gmra.mxu0 %v3392_v45  ;;  %2390 = vmatprep.subr.mxu0 %v2135_v33  ;;  %v1387_v45 = vld [vmem:[%s4121_s6 + $0x8] sm:$0xff] }
 0x290   :  { %2308 = vmatprep.subr.mxu1 %v1389_v38  ;;  %2391 = vmatpush3.msra.mxu0 %v2135_v33 }
 0x291   :  { %2309 = vmatpush3.msra.mxu1 %v1389_v38  ;;  %2392 = vmatprep.subr.mxu0 %v2134_v63 }
 0x292   :  { %2310 = vmatprep.subr.mxu1 %v1388_v54  ;;  %2115 = vmatprep.mubr.msk.f32.mxu0 %vm603_vm3, %v3403_v48  ;;  %v3822_v48 = vld [vmem:[%s4121_s6 + $0xf8] sm:$0xff] }
 0x293   :  { %2393 = vmatpush3.msra.mxu0 %v2134_v63  ;;  %2311 = vmatpush3.msra.mxu1 %v1388_v54 }
 0x294   :  { %1587 = vmatmul.mubr.f32.gmra.mxu0 %v3417_v53  ;;  %2394 = vmatprep.subr.mxu0 %v2133_v41 }
 0x295   :  { %2312 = vmatprep.subr.mxu1 %v1387_v45  ;;  %2395 = vmatpush3.msra.mxu0 %v2133_v41 }
 0x296   :  { %2313 = vmatpush3.msra.mxu1 %v1387_v45  ;;  %2396 = vmatprep.subr.mxu0 %v2132_v35 }
 0x297   :  { %2314 = vmatprep.subr.mxu1 %v1386_v61  ;;  %2397 = vmatpush3.msra.mxu0 %v2132_v35 }
 0x298   :  { %2315 = vmatpush3.msra.mxu1 %v1386_v61 }
 0x299   :  { %2325 = vmatprep.subr.mxu1 %v3822_v48 }
 0x305   :  { %v1185_v53 = vpop.f32.mrf.mxu0 }
 0x306   :  { %v1189_v6 = vmul.f32 0.001953125, %v1185_v53 }
 0x307   :  { %v2283_v1 = vpop.f32.mrf.mxu0 }
 0x308   :  { %v1190_v10 = vmul.f32 %v1189_v6, %v1189_v6 }
 0x30a   :  { %v1192_v11 = vrot.slane %v1190_v10, 6 }
 0x30c   :  { %v1194_v5 = vsub.f32 %v1189_v6, %v1192_v11 }
 0x30e   :  { %v1195_v7 = vadd.f32 1e-05, %v1194_v5 }
 0x310   :  { %2447 = vrsqrt.f32 %v1195_v7 }
 0x31d   :  { %v2448_v29 = vpop.eup %2447 }
 0x31e   :  { %v1200_v16 = vmul.f32 %v2448_v29, %v1198_v25  ;;  %v1267_v23 = vmul.f32 %v2448_v29, %v1265_v47 }
 0x320   :  { %v1202_v46 = vrot.slane %v1200_v16, 2  ;;  %v1269_v56 = vrot.slane %v1267_v23, 2  ;;  %v1212_v52 = vrot.slane %v1200_v16, %v1211_v42  ;;  %v1279_v0 = vrot.slane %v1267_v23, %v1278_v32 }
 0x322   :  { %v1204_v51 = vmul.f32 %v1202_v46, %v1189_v6  ;;  %v1271_v58 = vmul.f32 %v1269_v56, %v1189_v6  ;;  %v1213_v14 = vmul.f32 %v1212_v52, %v3542_v28  ;;  %v1214_v26 = vmul.f32 %v1212_v52, %v3538_v20 }
 0x323   :  { %v1215_v37 = vmul.f32 %v1212_v52, %v3546_v50  ;;  %v1280_v33 = vmul.f32 %v1279_v0, %v3548_v31  ;;  %v1281_v38 = vmul.f32 %v1279_v0, %v3544_v44  ;;  %v1282_v63 = vmul.f32 %v1279_v0, %v3560_v57 }
 0x324   :  { %v1206_v62 = vrot.slane %v1204_v51, 7  ;;  %v1273_v22 = vrot.slane %v1271_v58, 6  ;;  %v1283_v54 = vmul.f32 %v1279_v0, %v3574_v8  ;;  %v1284_v41 = vmul.f32 %v1279_v0, %v3591_v59 }
 0x325   :  { %v1285_v61 = vmul.f32 %v1279_v0, %v3602_v12  ;;  %v1216_v10 = vmul.f32 %v1212_v52, %v3564_v27  ;;  %v1217_v11 = vmul.f32 %v1212_v52, %v3583_v4  ;;  %v1218_v5 = vmul.f32 %v1212_v52, %v3594_v36 }
 0x326   :  { %v1208_v3 = vsub.f32 %v3828_v13, %v1206_v62  ;;  %v1275_v30 = vsub.f32 %v3828_v13, %v1273_v22 }
 0x328   :  { %v1222_v39 = vrot.slane %v1208_v3, %v1221_v19  ;;  %v1289_v28 = vrot.slane %v1275_v30, %v1278_v32 }
 0x32a   :  { %v1223_v45 = vadd.f32 %v1222_v39, %v1213_v14  ;;  %v1224_v20 = vadd.f32 %v1222_v39, %v1214_v26  ;;  %v1225_v35 = vadd.f32 %v1222_v39, %v1215_v37  ;;  %v3850_v50 = vadd.f32 %v1289_v28, %v1280_v33 }
 0x32b   :  { %v3852_v53 = vadd.f32 %v1289_v28, %v1281_v38  ;;  %v3854_v6 = vadd.f32 %v1289_v28, %v1282_v63  ;;  %v3856_v31 = vadd.f32 %v1289_v28, %v1283_v54  ;;  %v3858_v8 = vadd.f32 %v1289_v28, %v1284_v41  ;;  %v4134_v38 = vld [vmem:[#allocation2_spill] sm:$0xff]  ;;  %v4135_v41 = vld [vmem:[#allocation3_spill] sm:$0xff] }
 0x32c   :  { %v2096_v44 = vmul.f32 -1.442695, %v1223_v45  ;;  %v2097_v57 = vmul.f32 -1.442695, %v1224_v20  ;;  %v2098_v1 = vmul.f32 -1.442695, %v1225_v35  ;;  %v3860_v59 = vadd.f32 %v1289_v28, %v1285_v61 }
 0x32d   :  { %v1226_v12 = vadd.f32 %v1222_v39, %v1216_v10  ;;  %v1227_v7 = vadd.f32 %v1222_v39, %v1217_v11  ;;  %v1228_v18 = vadd.f32 %v1222_v39, %v1218_v5 }
 0x32e   :  { %2449 = vpow2.f32 %v2096_v44 }
 0x32f   :  { %2451 = vpow2.f32 %v2097_v57  ;;  %v2099_v25 = vmul.f32 -1.442695, %v1226_v12  ;;  %v2100_v47 = vmul.f32 -1.442695, %v1227_v7  ;;  %v2101_v29 = vmul.f32 -1.442695, %v1228_v18 }
 0x330   :  { %2453 = vpow2.f32 %v2098_v1  ;;  %v2130_v1 = vld [vmem:[%s4121_s6 + $0xf0] sm:$0xff]  ;;  %v2129_v12 = vld [vmem:[%s4121_s6 + $0xe8] sm:$0xff]  ;;  %v2128_v7 = vld [vmem:[%s4121_s6 + $0xe0] sm:$0xff] }
 0x331   :  { %2455 = vpow2.f32 %v2099_v25  ;;  %v2126_v18 = vld [vmem:[%s4121_s6 + $0xd0] sm:$0xff]  ;;  %v2125_v25 = vld [vmem:[%s4121_s6 + $0xc8] sm:$0xff] }
 0x332   :  { %2457 = vpow2.f32 %v2100_v47  ;;  %v2124_v47 = vld [vmem:[%s4121_s6 + $0xc0] sm:$0xff] }
 0x333   :  { %2459 = vpow2.f32 %v2101_v29  ;;  %v2123_v29 = vld [vmem:[%s4121_s6 + $0xb8] sm:$0xff] }
 0x33b   :  { %v2450_v16 = vpop.eup %2449 }
 0x33c   :  { %v2452_v23 = vpop.eup %2451  ;;  %v1247_v42 = vadd.f32 1.0, %v2450_v16  ;;  %v2122_v16 = vld [vmem:[%s4121_s6 + $0xb0] sm:$0xff] }
 0x33d   :  { %v2454_v27 = vpop.eup %2453  ;;  %v1248_v46 = vadd.f32 1.0, %v2452_v23  ;;  %v2121_v23 = vld [vmem:[%s4121_s6 + $0xa8] sm:$0xff] }
 0x33e   :  { %2461 = vrcp.f32 %v1247_v42  ;;  %v1249_v4 = vadd.f32 1.0, %v2454_v27  ;;  %v2456_v56 = vpop.eup %2455  ;;  %v2120_v42 = vld [vmem:[%s4121_s6 + $0xa0] sm:$0xff]  ;;  %v2119_v27 = vld [vmem:[%s4121_s6 + $0x98] sm:$0xff] }
 0x33f   :  { %2463 = vrcp.f32 %v1248_v46  ;;  %v2458_v36 = vpop.eup %2457  ;;  %v1250_v32 = vadd.f32 1.0, %v2456_v56  ;;  %v2118_v46 = vld [vmem:[%s4121_s6 + $0x90] sm:$0xff]  ;;  %v2116_v56 = vld [vmem:[%s4121_s6 + $0x80] sm:$0xff] }
 0x340   :  { %2465 = vrcp.f32 %v1249_v4  ;;  %v2460_v51 = vpop.eup %2459  ;;  %v1251_v52 = vadd.f32 1.0, %v2458_v36  ;;  %v2117_v4 = vld [vmem:[%s4121_s6 + $0x88] sm:$0xff]  ;;  %v3966_v36 = vpop.f32.mrf.mxu0 }
 0x341   :  { %2467 = vrcp.f32 %v1250_v32  ;;  %v1252_v58 = vadd.f32 1.0, %v2460_v51  ;;  %v2511_v51 = vld [vmem:[%s4119_s8 + $0x78] sm:$0xff] }
 0x342   :  { %2469 = vrcp.f32 %v1251_v52  ;;  %v1565_v32 = vpop.f32.mrf.mxu0  ;;  %v2512_v52 = vld [vmem:[%s4119_s8 + $0x70] sm:$0xff] }
 0x343   :  { %2471 = vrcp.f32 %v1252_v58  ;;  %v2513_v58 = vld [vmem:[%s4119_s8 + $0x68] sm:$0xff] }
 0x34b   :  { %v2462_v62 = vpop.eup %2461 }
 0x34c   :  { %v2464_v0 = vpop.eup %2463  ;;  %v1332_v22 = vmul.f32 %v2462_v62, %v3109_v9  ;;  %v2514_v62 = vld [vmem:[%s4119_s8 + $0x60] sm:$0xff] }
 0x34d   :  { %v2466_v3 = vpop.eup %2465  ;;  %v3867_v14 = vmul.f32 %v2464_v0, %v3133_v24  ;;  %v1568_v0 = vpop.f32.mrf.mxu0 }
 0x34e   :  { %2008 = vst [vmem:[%s4123_s12] sm:$0xff] %v1332_v22  ;;  %v3873_v26 = vmul.f32 %v2466_v3, %v3156_v34  ;;  %v2468_v30 = vpop.eup %2467  ;;  %v1353_v20 = vrot.slane %v1332_v22, 1 }
 0x34f   :  { %2009 = vst [vmem:[%s4123_s12 + $0x8] sm:$0xff] %v3867_v14  ;;  %v2470_v37 = vpop.eup %2469  ;;  %v3884_v39 = vmul.f32 %v2468_v30, %v3180_v43  ;;  %v1354_v35 = vrot.slane %v3867_v14, 1  ;;  %v1570_v3 = vpop.f32.mrf.mxu0 }
 0x350   :  { %2010 = vst [vmem:[%s4123_s12 + $0x10] sm:$0xff] %v3873_v26  ;;  %v2472_v33 = vpop.eup %2471  ;;  %v3887_v63 = vmul.f32 %v2470_v37, %v4134_v38  ;;  %v1356_v44 = vrot.slane %v3873_v26, 1  ;;  %v2518_v37 = vld [vmem:[%s4119_s8 + $0x40] sm:$0xff] }
 0x351   :  { %2398 = vmatprep.mubr.f32.mxu0 %v3884_v39  ;;  %2011 = vst [vmem:[%s4123_s12 + $0x18] sm:$0xff] %v3884_v39  ;;  %v1341_v54 = vrot.slane %v3884_v39, 7  ;;  %v3897_v28 = vmul.f32 %v2472_v33, %v4135_v41  ;;  %v1355_v11 = vsel %vm374_vm1, %v1353_v20, %v1354_v35  ;;  %v1573_v30 = vpop.f32.mrf.mxu0  ;;  %v2519_v33 = vld [vmem:[%s4119_s8 + $0x38] sm:$0xff]  ;;  %v2522_v20 = vld [vmem:[%s4119_s8 + $0x20] sm:$0xff] }
 0x352   :  { %2399 = vmatmul.mubr.f32.vlgmr.msra.gmra.mxu0 %v3887_v63  ;;  %2012 = vst [vmem:[%s4123_s12 + $0x20] sm:$0xff] %v3887_v63  ;;  %v1342_v45 = vrot.slane %v3887_v63, 7  ;;  %v1357_v5 = vsel %vm374_vm1, %v1354_v35, %v1356_v44 }
 0x353   :  { %2316 = vmatprep.mubr.msk.f32.mxu1 %vm2108_vm8, %v1341_v54  ;;  %2401 = vmatprep.mubr.f32.mxu0 %v3897_v28  ;;  %2013 = vst [vmem:[%s4123_s12 + $0x28] sm:$0xff] %v3897_v28  ;;  %v1344_v61 = vrot.slane %v3897_v28, 7 }
 0x354   :  { %v1343_v57 = vsel %vm1113_vm5, %v1341_v54, %v1342_v45  ;;  %v2520_v54 = vld [vmem:[%s4119_s8 + $0x30] sm:$0xff] }
 0x355   :  { %2317 = vmatmul.mubr.f32.vlgmr.msra.gmra.mxu1 %v1343_v57  ;;  %v1345_v10 = vsel %vm1113_vm5, %v1342_v45, %v1344_v61  ;;  %v2521_v45 = vld [vmem:[%s4119_s8 + $0x28] sm:$0xff]  ;;  %v2523_v61 = vld [vmem:[%s4119_s8 + $0x18] sm:$0xff]  ;;  %v2524_v57 = vld [vmem:[%s4119_s8 + $0x10] sm:$0xff] }
 0x356   :  { %2326 = vmatpush3.msra.mxu1 %v3822_v48  ;;  %2319 = vmatprep.mubr.f32.mxu1 %v1345_v10  ;;  %v2127_v48 = vld [vmem:[%s4121_s6 + $0xd8] sm:$0xff]  ;;  %v2525_v10 = vld [vmem:[%s4119_s8 + $0x8] sm:$0xff] }
 0x357   :  { %2327 = vmatprep.subr.mxu1 %v2130_v1  ;;  %2402 = vmatmul.mubr.f32.gmra.mxu0 %v1355_v11 }
 0x358   :  { %2328 = vmatpush3.msra.mxu1 %v2130_v1  ;;  %2404 = vmatprep.mubr.f32.mxu0 %v1357_v5 }
 0x359   :  { %2329 = vmatprep.subr.mxu1 %v2129_v12  ;;  %2320 = vmatmul.mubr.f32.gmra.mxu1 %v1332_v22 }
 0x35a   :  { %2330 = vmatpush3.msra.mxu1 %v2129_v12  ;;  %2322 = vmatprep.mubr.f32.mxu1 %v3867_v14  ;;  %v2526_v12 = vld [vmem:[%s4119_s8] sm:$0xff] }
 0x35b   :  { %2331 = vmatprep.subr.mxu1 %v2128_v7  ;;  %2405 = vmatmul.mubr.msk.f32.gmra.mxu0 %vm374_vm1, %v1356_v44 }
 0x35c   :  { %2332 = vmatpush3.msra.mxu1 %v2128_v7 }
 0x35d   :  { %2333 = vmatprep.subr.mxu1 %v2127_v48  ;;  %2323 = vmatmul.mubr.f32.gmra.mxu1 %v3873_v26 }
 0x35e   :  { %2334 = vmatpush3.msra.mxu1 %v2127_v48  ;;  %2357 = vmatprep.mubr.f32.mxu1 %v1332_v22  ;;  %v2515_v22 = vld [vmem:[%s4119_s8 + $0x58] sm:$0xff] }
 0x35f   :  { %2335 = vmatprep.subr.mxu1 %v2126_v18 }
 0x360   :  { %2336 = vmatpush3.msra.mxu1 %v2126_v18 }
 0x361   :  { %2337 = vmatprep.subr.mxu1 %v2125_v25 }
 0x362   :  { %2338 = vmatpush3.msra.mxu1 %v2125_v25 }
 0x363   :  { %2339 = vmatprep.subr.mxu1 %v2124_v47 }
 0x364   :  { %2340 = vmatpush3.msra.mxu1 %v2124_v47 }
 0x365   :  { %2341 = vmatprep.subr.mxu1 %v2123_v29 }
 0x366   :  { %2342 = vmatpush3.msra.mxu1 %v2123_v29 }
 0x367   :  { %2343 = vmatprep.subr.mxu1 %v2122_v16 }
 0x368   :  { %2344 = vmatpush3.msra.mxu1 %v2122_v16 }
 0x369   :  { %2345 = vmatprep.subr.mxu1 %v2121_v23 }
 0x36a   :  { %2346 = vmatpush3.msra.mxu1 %v2121_v23 }
 0x36b   :  { %2347 = vmatprep.subr.mxu1 %v2120_v42 }
 0x36c   :  { %2348 = vmatpush3.msra.mxu1 %v2120_v42 }
 0x36d   :  { %2349 = vmatprep.subr.mxu1 %v2119_v27 }
 0x36e   :  { %2350 = vmatpush3.msra.mxu1 %v2119_v27 }
 0x36f   :  { %2351 = vmatprep.subr.mxu1 %v2118_v46 }
 0x370   :  { %2352 = vmatpush3.msra.mxu1 %v2118_v46 }
 0x371   :  { %2353 = vmatprep.subr.mxu1 %v2117_v4 }
 0x372   :  { %2354 = vmatpush3.msra.mxu1 %v2117_v4 }
 0x373   :  { %2355 = vmatprep.subr.mxu1 %v2116_v56 }
 0x374   :  { %2356 = vmatpush3.msra.mxu1 %v2116_v56 }
 0x375   :  { %2358 = vmatmul.mubr.f32.vlgmr.msra.gmra.mxu1 %v3867_v14  ;;  %2407 = vmatprep.subr.mxu1 %v4133_v55  ;;  %v2516_v14 = vld [vmem:[%s4119_s8 + $0x50] sm:$0xff] }
 0x376   :  { %2360 = vmatprep.mubr.f32.mxu1 %v3873_v26  ;;  %2408 = vmatpush3.msra.mxu1 %v2511_v51  ;;  %v2517_v26 = vld [vmem:[%s4119_s8 + $0x48] sm:$0xff] }
 0x377   :  { %2409 = vmatprep.subr.mxu1 %v4133_v55 }
 0x378   :  { %2410 = vmatpush3.msra.mxu1 %v2512_v52 }
 0x379   :  { %2361 = vmatmul.mubr.f32.gmra.mxu1 %v3884_v39  ;;  %2411 = vmatprep.subr.mxu1 %v4133_v55  ;;  %v1575_v39 = vpop.f32.mrf.mxu0 }
 0x37a   :  { %2363 = vmatprep.mubr.f32.mxu1 %v3887_v63  ;;  %2412 = vmatpush3.msra.mxu1 %v2513_v58 }
 0x37b   :  { %2413 = vmatprep.subr.mxu1 %v4133_v55  ;;  %v1578_v63 = vpop.f32.mrf.mxu0 }
 0x37c   :  { %2414 = vmatpush3.msra.mxu1 %v2514_v62 }
 0x37d   :  { %2364 = vmatmul.mubr.f32.gmra.mxu1 %v3897_v28  ;;  %2415 = vmatprep.subr.mxu1 %v4133_v55  ;;  %v1580_v28 = vpop.f32.mrf.mxu0 }
 0x37e   :  { %2416 = vmatpush3.msra.mxu1 %v2515_v22  ;;  %2439 = vmatprep.mubr.msk.f32.mxu1 %vm2529_vm4, %v4133_v55 }
 0x37f   :  { %2417 = vmatprep.subr.mxu1 %v4133_v55  ;;  %v1583_v35 = vpop.f32.mrf.mxu0 }
 0x380   :  { %2418 = vmatpush3.msra.mxu1 %v2516_v14 }
 0x381   :  { %2419 = vmatprep.subr.mxu1 %v4133_v55  ;;  %v1585_v44 = vpop.f32.mrf.mxu0 }
 0x382   :  { %2420 = vmatpush3.msra.mxu1 %v2517_v26 }
 0x383   :  { %2421 = vmatprep.subr.mxu1 %v4133_v55  ;;  %v1588_v1 = vpop.f32.mrf.mxu0 }
 0x384   :  { %2422 = vmatpush3.msra.mxu1 %v2518_v37 }
 0x385   :  { %2423 = vmatprep.subr.mxu1 %v4133_v55  ;;  %v1590_v11 = vpop.f32.mrf.mxu0 }
 0x386   :  { %2424 = vmatpush3.msra.mxu1 %v2519_v33 }
 0x387   :  { %2425 = vmatprep.subr.mxu1 %v4133_v55 }
 0x388   :  { %2426 = vmatpush3.msra.mxu1 %v2520_v54 }
 0x389   :  { %2427 = vmatprep.subr.mxu1 %v4133_v55 }
 0x38a   :  { %2428 = vmatpush3.msra.mxu1 %v2521_v45 }
 0x38b   :  { %2429 = vmatprep.subr.mxu1 %v4133_v55 }
 0x38c   :  { %2430 = vmatpush3.msra.mxu1 %v2522_v20 }
 0x38d   :  { %2431 = vmatprep.subr.mxu1 %v4133_v55 }
 0x38e   :  { %2432 = vmatpush3.msra.mxu1 %v2523_v61 }
 0x38f   :  { %2433 = vmatprep.subr.mxu1 %v4133_v55 }
 0x390   :  { %2434 = vmatpush3.msra.mxu1 %v2524_v57 }
 0x391   :  { %2435 = vmatprep.subr.mxu1 %v4133_v55 }
 0x392   :  { %2436 = vmatpush3.msra.mxu1 %v2525_v10 }
 0x393   :  { %2437 = vmatprep.subr.mxu1 %v4133_v55 }
 0x394   :  { %2438 = vmatpush3.msra.mxu1 %v2526_v12 }
 0x412   :  { %v2400_v25 = vpop.f32.mrf.mxu0 }
 0x414   :  { %v1793_v29 = vpop.f32.mrf.mxu0 }
 0x415   :  { %v2318_v5 = vpop.f32.mrf.mxu1 }
 0x416   :  { %v1569_v23 = vadd.f32 %v2318_v5, %v1568_v0 }
 0x417   :  { %v1468_v7 = vpop.f32.mrf.mxu1  ;;  %v2403_v42 = vpop.f32.mrf.mxu0 }
 0x418   :  { %v1564_v46 = vadd.f32 %v3966_v36, %v1468_v7 }
 0x419   :  { %v2321_v48 = vpop.f32.mrf.mxu1  ;;  %v1803_v52 = vpop.f32.mrf.mxu0 }
 0x41a   :  { %v1579_v56 = vadd.f32 %v2321_v48, %v1578_v63 }
 0x41b   :  { %v1478_v18 = vpop.f32.mrf.mxu1  ;;  %v2406_v39 = vpop.f32.mrf.mxu0 }
 0x41c   :  { %v1574_v62 = vadd.f32 %v1573_v30, %v1478_v18 }
 0x41d   :  { %v2324_v47 = vpop.f32.mrf.mxu1  ;;  %v1813_v10 = vpop.f32.mrf.mxu0 }
 0x41e   :  { %v1589_v33 = vadd.f32 %v2324_v47, %v1588_v1 }
 0x41f   :  { %v1488_v16 = vpop.f32.mrf.mxu1 }
 0x420   :  { %v1584_v54 = vadd.f32 %v1583_v35, %v1488_v16 }
 0x435   :  { %v2359_v27 = vpop.f32.mrf.mxu1 }
 0x436   :  { %v1705_v55 = vadd.f32 %v2359_v27, %v1569_v23 }
 0x437   :  { %v1675_v4 = vpop.f32.mrf.mxu1 }
 0x438   :  { %v4040_v32 = vadd.f32 %v2400_v25, %v1705_v55  ;;  %v1704_v51 = vadd.f32 %v1675_v4, %v1564_v46 }
 0x439   :  { %v2362_v58 = vpop.f32.mrf.mxu1 }
 0x43a   :  { %v4042_v22 = vadd.f32 %v1793_v29, %v1704_v51  ;;  %v1707_v3 = vadd.f32 %v2362_v58, %v1579_v56  ;;  %v1829_v0 = vmul.f32 %v4040_v32, %v3540_v49 }
 0x43b   :  { %v1685_v14 = vpop.f32.mrf.mxu1 }
 0x43c   :  { %v1828_v26 = vmul.f32 %v4042_v22, %v3536_v15  ;;  %v4048_v36 = vadd.f32 %v2403_v42, %v1707_v3  ;;  %v1706_v37 = vadd.f32 %v1685_v14, %v1574_v62  ;;  %v1846_v49 = vmul.f32 %v1829_v0, %v4040_v32 }
 0x43d   :  { %v2365_v63 = vpop.f32.mrf.mxu1 }
 0x43e   :  { %v1845_v28 = vmul.f32 %v1828_v26, %v4042_v22  ;;  %v4051_v30 = vadd.f32 %v1803_v52, %v1706_v37  ;;  %v1831_v45 = vmul.f32 %v4048_v36, %v3562_v2  ;;  %v1709_v20 = vadd.f32 %v2365_v63, %v1589_v33 }
 0x43f   :  { %v1695_v61 = vpop.f32.mrf.mxu1  ;;  %v1834_v44 = vadd.f32 %v1829_v0, %v1828_v26 }
 0x440   :  { %v1830_v15 = vmul.f32 %v4051_v30, %v3552_v60  ;;  %v1708_v57 = vadd.f32 %v1695_v61, %v1584_v54  ;;  %v4058_v1 = vadd.f32 %v2406_v39, %v1709_v20  ;;  %v1851_v35 = vadd.f32 %v1846_v49, %v1845_v28 }
 0x441   :  { %v1848_v2 = vmul.f32 %v1831_v45, %v4048_v36  ;;  %v2102_v54 = vmul.f32 -1.442695, %v3850_v50  ;;  %v2104_v20 = vmul.f32 -1.442695, %v3854_v6  ;;  %v2105_v49 = vmul.f32 -1.442695, %v3856_v31 }
 0x442   :  { %v1835_v11 = vadd.f32 %v1834_v44, %v1830_v15  ;;  %v1847_v12 = vmul.f32 %v1830_v15, %v4051_v30  ;;  %v4061_v5 = vadd.f32 %v1813_v10, %v1708_v57  ;;  %v1833_v48 = vmul.f32 %v4058_v1, %v3596_v40 }
 0x443   :  { %2473 = vpow2.f32 %v2102_v54  ;;  %v2106_v44 = vmul.f32 -1.442695, %v3858_v8  ;;  %v2107_v15 = vmul.f32 -1.442695, %v3860_v59  ;;  %v1941_v50 = vrot.slane %v3828_v13, 3 }
 0x444   :  { %v1852_v7 = vadd.f32 %v1851_v35, %v1847_v12  ;;  %v1832_v18 = vmul.f32 %v4061_v5, %v3579_v17  ;;  %v1836_v60 = vadd.f32 %v1835_v11, %v1831_v45  ;;  %v1850_v16 = vmul.f32 %v1833_v48, %v4058_v1 }
 0x445   :  { %v2103_v45 = vmul.f32 -1.442695, %v3852_v53 }
 0x446   :  { %v1837_v25 = vadd.f32 %v1836_v60, %v1832_v18  ;;  %v1849_v47 = vmul.f32 %v1832_v18, %v4061_v5  ;;  %v1853_v29 = vadd.f32 %v1852_v7, %v1848_v2 }
 0x448   :  { %v1838_v23 = vadd.f32 %v1837_v25, %v1833_v48  ;;  %v1854_v42 = vadd.f32 %v1853_v29, %v1849_v47  ;;  %v1964_v47 = vsub.s32 5, %v3832_v21 }
 0x44a   :  { %v1839_v27 = vrot.slane %v1838_v23, 4  ;;  %v1855_v46 = vadd.f32 %v1854_v42, %v1850_v16 }
 0x44c   :  { %v1840_v55 = vadd.f32 %v1839_v27, %v1838_v23  ;;  %v1856_v4 = vrot.slane %v1855_v46, 4 }
 0x44e   :  { %v1857_v56 = vadd.f32 %v1856_v4, %v1855_v46  ;;  %v1841_v51 = vrot.slane %v1840_v55, 2 }
 0x450   :  { %v1842_v52 = vadd.f32 %v1841_v51, %v1840_v55  ;;  %v1858_v40 = vrot.slane %v1857_v56, 2  ;;  %v2474_v57 = vpop.eup %2473 }
 0x451   :  { %v1314_v12 = vadd.f32 1.0, %v2474_v57 }
 0x452   :  { %v1843_v58 = vrot.slane %v1842_v52, 1  ;;  %v1859_v62 = vadd.f32 %v1858_v40, %v1857_v56 }
 0x454   :  { %v1860_v17 = vrot.slane %v1859_v62, 1  ;;  %v1844_v3 = vadd.f32 %v1843_v58, %v1842_v52 }
 0x456   :  { %v1861_v14 = vadd.f32 %v1860_v17, %v1859_v62 }
 0x458   :  { %v1862_v0 = vsel %vm1113_vm5, %v1844_v3, %v1861_v14 }
 0x459   :  { %2440 = vmatmul.mubr.f32.vlgmr.msra.gmra.mxu1 %v1862_v0 }
 0x519   :  { %v1929_v26 = vpop.f32.mrf.mxu1 }
 0x51a   :  { %v1933_v37 = vmul.f32 0.001953125, %v1929_v26 }
 0x51b   :  { %v2441_v39 = vpop.f32.mrf.mxu1 }
 0x51c   :  { %v1934_v33 = vmul.f32 %v1933_v37, %v1933_v37 }
 0x51e   :  { %v1936_v63 = vrot.slane %v1934_v33, 7 }
 0x520   :  { %v1938_v28 = vsub.f32 %v1933_v37, %v1936_v63 }
 0x522   :  { %v1939_v61 = vadd.f32 1e-05, %v1938_v28 }
 0x524   :  { %2475 = vrsqrt.f32 %v1939_v61 }
 0x525   :  { %2477 = vpow2.f32 %v2103_v45 }
 0x526   :  { %2479 = vpow2.f32 %v2104_v20 }
 0x527   :  { %2481 = vpow2.f32 %v2105_v49 }
 0x528   :  { %2483 = vpow2.f32 %v2106_v44 }
 0x529   :  { %2485 = vpow2.f32 %v2107_v15 }
 0x52a   :  { %2487 = vrcp.f32 %v1314_v12 }
 0x531   :  { %v2476_v53 = vpop.eup %2475 }
 0x532   :  { %v2478_v10 = vpop.eup %2477  ;;  %v1943_v6 = vmul.f32 %v2476_v53, %v1941_v50 }
 0x533   :  { %v2480_v35 = vpop.eup %2479  ;;  %v1315_v2 = vadd.f32 1.0, %v2478_v10 }
 0x534   :  { %v2482_v11 = vpop.eup %2481  ;;  %v1945_v31 = vrot.slane %v1943_v6, 1  ;;  %v1316_v48 = vadd.f32 1.0, %v2480_v35  ;;  %v1955_v25 = vrot.slane %v1943_v6, %v1221_v19 }
 0x535   :  { %v2484_v7 = vpop.eup %2483  ;;  %v1317_v18 = vadd.f32 1.0, %v2482_v11  ;;  %2489 = vrcp.f32 %v1315_v2 }
 0x536   :  { %v1947_v8 = vmul.f32 %v1945_v31, %v1933_v37  ;;  %v2486_v60 = vpop.eup %2485  ;;  %v1318_v29 = vadd.f32 1.0, %v2484_v7  ;;  %2491 = vrcp.f32 %v1316_v48  ;;  %v1956_v42 = vmul.f32 %v1955_v25, %v4042_v22 }
 0x537   :  { %v1319_v23 = vadd.f32 1.0, %v2486_v60  ;;  %2493 = vrcp.f32 %v1317_v18  ;;  %v1957_v27 = vmul.f32 %v1955_v25, %v4040_v32  ;;  %v1958_v46 = vmul.f32 %v1955_v25, %v4051_v30  ;;  %v2488_v32 = vpop.eup %2487 }
 0x538   :  { %v1949_v59 = vrot.slane %v1947_v8, 3  ;;  %2495 = vrcp.f32 %v1318_v29  ;;  %v1959_v4 = vmul.f32 %v1955_v25, %v4048_v36  ;;  %v1960_v19 = vmul.f32 %v1955_v25, %v4061_v5 }
 0x539   :  { %2497 = vrcp.f32 %v1319_v23  ;;  %v1978_v62 = vsub.f32 1.0, %v2488_v32 }
 0x53a   :  { %v1951_v16 = vsub.f32 %v3828_v13, %v1949_v59  ;;  %v1961_v13 = vmul.f32 %v1955_v25, %v4058_v1 }
 0x53b   :  { %v1984_v39 = vmul.f32 %v1978_v62, %v3109_v9 }
 0x53c   :  { %v1965_v55 = vrot.slane %v1951_v16, %v1964_v47 }
 0x53e   :  { %v1966_v21 = vadd.f32 %v1965_v55, %v1956_v42  ;;  %v1967_v56 = vadd.f32 %v1965_v55, %v1957_v27  ;;  %v1968_v51 = vadd.f32 %v1965_v55, %v1958_v46  ;;  %v1969_v52 = vadd.f32 %v1965_v55, %v1959_v4 }
 0x53f   :  { %v1970_v40 = vadd.f32 %v1965_v55, %v1960_v19  ;;  %v1971_v22 = vadd.f32 %v1965_v55, %v1961_v13 }
 0x540   :  { %2499 = vtanh.f32 %v1966_v21 }
 0x541   :  { %2501 = vtanh.f32 %v1967_v56 }
 0x542   :  { %2503 = vtanh.f32 %v1968_v51  ;;  %v2490_v30 = vpop.eup %2489 }
 0x543   :  { %2505 = vtanh.f32 %v1969_v52  ;;  %v2492_v36 = vpop.eup %2491  ;;  %v1979_v17 = vsub.f32 1.0, %v2490_v30 }
 0x544   :  { %2507 = vtanh.f32 %v1970_v40  ;;  %v2494_v58 = vpop.eup %2493  ;;  %v1980_v14 = vsub.f32 1.0, %v2492_v36 }
 0x545   :  { %2509 = vtanh.f32 %v1971_v22  ;;  %v2496_v5 = vpop.eup %2495  ;;  %v1981_v1 = vsub.f32 1.0, %v2494_v58  ;;  %v1985_v28 = vmul.f32 %v1979_v17, %v3133_v24 }
 0x546   :  { %v2498_v3 = vpop.eup %2497  ;;  %v1982_v37 = vsub.f32 1.0, %v2496_v5  ;;  %v1986_v61 = vmul.f32 %v1980_v14, %v3156_v34 }
 0x547   :  { %v1983_v54 = vsub.f32 1.0, %v2498_v3  ;;  %v1987_v50 = vmul.f32 %v1981_v1, %v3180_v43 }
 0x548   :  { %v1988_v6 = vmul.f32 %v1982_v37, %v4134_v38 }
 0x549   :  { %v1989_v24 = vmul.f32 %v1983_v54, %v4135_v41 }
 0x54d   :  { %v2500_v0 = vpop.eup %2499 }
 0x54e   :  { %v2502_v26 = vpop.eup %2501  ;;  %v1990_v33 = vmul.f32 %v2500_v0, %v2488_v32 }
 0x54f   :  { %v2504_v63 = vpop.eup %2503  ;;  %v1991_v45 = vmul.f32 %v2502_v26, %v2490_v30 }
 0x550   :  { %v2506_v20 = vpop.eup %2505  ;;  %v1992_v49 = vmul.f32 %v2504_v63, %v2492_v36  ;;  %v1996_v44 = vadd.f32 %v1990_v33, %v1984_v39 }
 0x551   :  { %v2508_v15 = vpop.eup %2507  ;;  %v1993_v57 = vmul.f32 %v2506_v20, %v2494_v58  ;;  %v1997_v53 = vadd.f32 %v1991_v45, %v1985_v28 }
 0x552   :  { %v2510_v10 = vpop.eup %2509  ;;  %v1994_v9 = vmul.f32 %v2508_v15, %v2496_v5  ;;  %v1998_v35 = vadd.f32 %v1992_v49, %v1986_v61  ;;  %2002 = vst [vmem:[%s4124_s11] sm:$0xff] %v1996_v44 }
 0x553   :  { %v1995_v11 = vmul.f32 %v2510_v10, %v2498_v3  ;;  %v1999_v34 = vadd.f32 %v1993_v57, %v1987_v50  ;;  %2003 = vst [vmem:[%s4124_s11 + $0x8] sm:$0xff] %v1997_v53 }
 0x554   :  { %v2000_v43 = vadd.f32 %v1994_v9, %v1988_v6  ;;  %2004 = vst [vmem:[%s4124_s11 + $0x10] sm:$0xff] %v1998_v35 }
 0x555   :  { %v2001_v38 = vadd.f32 %v1995_v11, %v1989_v24  ;;  %2005 = vst [vmem:[%s4124_s11 + $0x18] sm:$0xff] %v1999_v34 }
 0x556   :  { %2006 = vst [vmem:[%s4124_s11 + $0x20] sm:$0xff] %v2000_v43 }
 0x557   :  { %2007 = vst [vmem:[%s4124_s11 + $0x28] sm:$0xff] %v2001_v38 }

</bundles_post_ra>
